<compile_context>
chip_gen: v6e
topology: v6e:2x2x1
jax: 0.10.0
libtpu: 0.0.40
codegen_flags: <defaults>
</compile_context>

<pallas_src>
import jax
import jax.numpy as jnp
from jax.experimental import pallas as pl
from jax.experimental.pallas import tpu as pltpu


_BYPASS_BYTES = 1 << 20      # below this, launch/per-step overhead dominates
_LANE_CAP_32 = 2048          # tL cap for 4-byte dtypes
_LANE_CAP_16 = 4096          # tL cap for <= 2-byte dtypes


def _swap_minor(tile):
    """(tL, tC) -> (tC, tL) minor-dim swap on the XLU (layout-aware)."""
    if hasattr(pltpu, "einshape"):
        try:
            return pltpu.einshape("lc->cl", tile)
        except Exception:
            pass  # fall back to the generic transpose lowering
    return jnp.transpose(tile, (1, 0))


def _unembed_kernel(x_ref, o_ref):
    # x_ref: (1, tL, tC) token tile; o_ref: (1, tC, tL) lane-dense output tile.
    # One vreg-friendly XLU transpose per grid step; no full (C, L) slab and
    # no in-kernel reshape (that happens for free in the wrapper).
    o_ref[0] = _swap_minor(x_ref[0])


def _tile_byte_budget():
    # Per-side tile budget: ~4 MiB keeps (in + out) x double-buffering plus
    # the transpose temp comfortably under v7x's 64 MiB VMEM; chips with
    # >= 96 MiB VMEM (v5e/v6e: 128 MiB) get larger tiles => fewer grid steps.
    try:
        vmem = pltpu.get_tpu_info().vmem_capacity_bytes
    except Exception:   # conservative default if the query is unavailable
        return 4 << 20
    return (6 << 20) if vmem >= (96 << 20) else (4 << 20)


def _pick_tiles(L, C, itemsize):
    """Pick (tL, tC) for the transpose tiles.  Returns None if nothing fits."""
    budget = _tile_byte_budget()
    lane_cap = _LANE_CAP_32 if itemsize >= 4 else _LANE_CAP_16

    # Candidate tL: multiples of 128 that divide L (largest first); the
    # full-dim fallback is always a legal block shape.
    tl_cands = [d for d in range(128, min(L, lane_cap) + 1, 128) if L % d == 0]
    tl_cands.sort(reverse=True)
    if not tl_cands:
        tl_cands = [L]

    # Prefer full-C tiles (fully contiguous HBM reads).  Only shrink tL down
    # to 256 lanes to preserve contiguity before falling back to tiling C.
    full_c_tl = next((d for d in tl_cands if d * C * itemsize <= budget), None)
    if full_c_tl is not None and (full_c_tl >= 256 or full_c_tl == tl_cands[0]):
        return full_c_tl, C

    # Forced to tile C: largest multiple-of-128 divisor that fits the budget.
    tc_cands = [d for d in range(128, C + 1, 128) if C % d == 0]
    tc_cands.sort(reverse=True)
    tL = tl_cands[0]
    tC = next((d for d in tc_cands if tL * d * itemsize <= budget), None)
    if tC is not None:
        return tL, tC
    if full_c_tl is not None:
        return full_c_tl, C
    return None


def patch_unembed(x, x_size, embed_dim):
    """x: (B, L, C) with L == H*W, C == embed_dim.  Returns (B, C, H, W)."""
    B, L, C = x.shape
    H, W = x_size
    assert L == H * W, "token count must equal H*W"
    assert C == embed_dim, "channel dim must equal embed_dim"

    itemsize = x.dtype.itemsize
    total_bytes = B * L * C * itemsize

    # Tiny inputs: kernel launch + per-grid-step overhead dominates and the
    # full-dim fallback would emit masked loads/stores; XLA's copy-transpose
    # is at least as good.
    if total_bytes <= _BYPASS_BYTES:
        return jnp.transpose(x, (0, 2, 1)).reshape(B, C, H, W)

    tiles = _pick_tiles(L, C, itemsize)
    if tiles is None:
        # Pathologically unaligned and too large to tile within the VMEM
        # budget -- let XLA handle it rather than risking a VMEM blowup.
        return jnp.transpose(x, (0, 2, 1)).reshape(B, C, H, W)
    tL, tC = tiles
    nL, nC = L // tL, C // tC

    # Explicit scoped-VMEM sizing: (in + out tile) x double buffering plus
    # ~50% headroom for the transpose temp; never below the 32 MiB v6e/v7x
    # default, capped well under v7x's 64 MiB physical VMEM.
    tile_bytes = tL * tC * itemsize
    vmem_limit = int(2 * (2 * tile_bytes) * 1.5) + (4 << 20)
    vmem_limit = max(32 << 20, min(vmem_limit, 48 << 20))

    if B == 1 and nC == 1 and nL >= 2 and nL % 2 == 0:
        # B and C axes are degenerate: peel a 2-way split off the L axis so the
        # v7x megacore split has real extent (no effect on single-core chips).
        half = nL // 2
        grid = (2, half)
        in_specs = [pl.BlockSpec((1, tL, tC),
                                 lambda o, i, half=half: (0, o * half + i, 0))]
        out_specs = pl.BlockSpec((1, tC, tL),
                                 lambda o, i, half=half: (0, 0, o * half + i))
        dims = ("parallel", "parallel")
    else:
        # li innermost: consecutive output tiles advance contiguously along L
        # within a (b, ci) band, so writeback DMAs stream sequentially in HBM.
        grid = (B, nC, nL)
        in_specs = [pl.BlockSpec((1, tL, tC), lambda b, ci, li: (b, li, ci))]
        out_specs = pl.BlockSpec((1, tC, tL), lambda b, ci, li: (b, ci, li))
        dims = ("parallel", "parallel", "parallel")

    out_bcl = pl.pallas_call(
        _unembed_kernel,
        out_shape=jax.ShapeDtypeStruct((B, C, L), x.dtype),
        grid_spec=pltpu.PrefetchScalarGridSpec(
            num_scalar_prefetch=0,
            grid=grid,
            in_specs=in_specs,
            out_specs=out_specs,
        ),
        compiler_params=pltpu.CompilerParams(
            dimension_semantics=dims,
            vmem_limit_bytes=vmem_limit,
        ),
        cost_estimate=pl.CostEstimate(
            flops=0, transcendentals=0, bytes_accessed=2 * total_bytes),
    )(x)

    # Free row-major metadata reshape: (B, C, L) -> (B, C, H, W).
    return out_bcl.reshape(B, C, H, W)


class PatchUnEmbed:
    """JAX/Pallas port of the PyTorch PatchUnEmbed module (no parameters)."""

    def __init__(self, img_size=224, patch_size=4, in_chans=3, embed_dim=96,
                 norm_layer=None):
        img_size = (img_size, img_size) if isinstance(img_size, int) else tuple(img_size)
        patch_size = (patch_size, patch_size) if isinstance(patch_size, int) else tuple(patch_size)
        patches_resolution = [img_size[0] // patch_size[0], img_size[1] // patch_size[1]]
        self.img_size = img_size
        self.patch_size = patch_size
        self.patches_resolution = patches_resolution
        self.num_patches = patches_resolution[0] * patches_resolution[1]
        self.in_chans = in_chans
        self.embed_dim = embed_dim

    def __call__(self, x, x_size):
        return patch_unembed(x, x_size, self.embed_dim)


def _reference(x, H, W):
    B, L, C = x.shape
    return jnp.transpose(x, (0, 2, 1)).reshape(B, C, H, W)


def _check(x, H, W):
    out = jax.block_until_ready(patch_unembed(x, (H, W), x.shape[-1]))
    ref = _reference(x, H, W)
    assert out.shape == ref.shape, (out.shape, ref.shape)
    assert out.dtype == x.dtype
    assert jnp.array_equal(out, ref), "mismatch vs reference"
    return out


if __name__ == "__main__":
    key = jax.random.PRNGKey(0)
    k1, k2, k3, k4 = jax.random.split(key, 4)

    # Case 1: tiny 8x8 map, C=32 -> small-input bypass path.
    B, H, W, C = 2, 8, 8, 32
    x = jax.random.normal(k1, (B, H * W, C), dtype=jnp.float32)
    module = PatchUnEmbed(img_size=32, patch_size=4, in_chans=3, embed_dim=C)
    out = jax.block_until_ready(module(x, (H, W)))
    assert out.shape == (B, C, H, W), out.shape
    assert out.dtype == x.dtype
    assert jnp.array_equal(out, _reference(x, H, W)), "mismatch (bypass case)"

    # Case 2: Pallas path, 128-aligned, full-C contiguous reads (tL=1024, tC=256).
    B2, H2, W2, C2 = 2, 32, 32, 256
    x2 = jax.random.normal(k2, (B2, H2 * W2, C2), dtype=jnp.float32)
    _check(x2, H2, W2)

    # Case 3: Pallas path with B=1 -> 2-way L split (v7x core-split coverage).
    B3, H3, W3, C3 = 1, 64, 64, 128
    x3 = jax.random.normal(k3, (B3, H3 * W3, C3), dtype=jnp.float32)
    _check(x3, H3, W3)

    # Case 4: bf16 with a non-multiple-of-128 channel count (full-C tile,
    # lane-dense output along L).
    B4, H4, W4, C4 = 2, 48, 48, 192
    x4 = jax.random.normal(k4, (B4, H4 * W4, C4), dtype=jnp.bfloat16)
    _check(x4, H4, W4)

    print("KERNEL_OK")
</pallas_src>

<mosaic_0001>
module attributes {stable_mosaic.version = 11 : i64} {
  func.func @_unembed_kernel(%arg0: i32, %arg1: i32, %arg2: i32, %arg3: memref<1x1024x256xf32, #tpu.memory_space<vmem>>, %arg4: memref<1x256x1024xf32, #tpu.memory_space<vmem>>) attributes {dimension_semantics = [#tpu.dimension_semantics<parallel>, #tpu.dimension_semantics<parallel>, #tpu.dimension_semantics<parallel>], iteration_bounds = array<i64: 2, 1, 1>, scalar_prefetch = 0 : i64, scratch_operands = 0 : i64, tpu.core_type = #tpu.core_type<tc>, window_params = [{transform_indices = @transform_0, window_bounds = array<i64: 1, 1024, 256>}, {transform_indices = @transform_1, window_bounds = array<i64: 1, 256, 1024>}]} {
    %c0 = arith.constant 0 : index
    %c0_0 = arith.constant 0 : index
    %c0_1 = arith.constant 0 : index
    %0 = vector.load %arg3[%c0, %c0_0, %c0_1] : memref<1x1024x256xf32, #tpu.memory_space<vmem>>, vector<1x1024x256xf32>
    %1 = vector.shape_cast %0 : vector<1x1024x256xf32> to vector<1024x256xf32>
    %2 = tpu.transpose %1, [1, 0] : vector<1024x256xf32> -> vector<256x1024xf32>
    %c0_2 = arith.constant 0 : index
    %c0_3 = arith.constant 0 : index
    %c0_4 = arith.constant 0 : index
    %3 = vector.load %arg4[%c0_2, %c0_3, %c0_4] : memref<1x256x1024xf32, #tpu.memory_space<vmem>>, vector<1x256x1024xf32>
    %4 = vector.shape_cast %3 : vector<1x256x1024xf32> to vector<256x1024xf32>
    %5 = vector.shape_cast %2 : vector<256x1024xf32> to vector<1x256x1024xf32>
    tpu.vector_store %arg4[%c0_2, %c0_3, %c0_4], %5 {strides = array<i32>} : memref<1x256x1024xf32, #tpu.memory_space<vmem>>, vector<1x256x1024xf32>,
    return
  }
  func.func @transform_0(%arg0: i32, %arg1: i32, %arg2: i32) -> (i32, i32, i32) {
    %c0_i32 = arith.constant 0 : i32
    return %arg0, %arg2, %arg1 : i32, i32, i32
  }
  func.func @transform_1(%arg0: i32, %arg1: i32, %arg2: i32) -> (i32, i32, i32) {
    %c0_i32 = arith.constant 0 : i32
    return %arg0, %arg1, %arg2 : i32, i32, i32
  }
}

</mosaic_0001>

<bundles_post_ra>
// kernel: tpu_custom_call.1
= control target key start
LH: loop header
LB: loop body
LE: loop exit
PB: predicated region body
PF: predicated region fallthrough
CT: control target
= control target key end

     0   :  { %6 = vsyncpa [#allocation3], 0  ;;  %s2184_s0 = inlined_call_operand.hbm [shape: f32[2,1024,256], index: 0, kind: input, shape index: {}]   ;;  %s2185_s1 = inlined_call_operand.hbm [shape: f32[2,256,1024], index: 1, kind: output, shape index: {}]  }
   0x1   :  { %8 = vsyncpa [#allocation3 + $0x1], 0 }
   0x2   :  { %9 = vsyncpa [#allocation4], 0 }
   0x3   :  { %11 = vsyncpa [#allocation4 + $0x1], 0  ;;  %s1517_s6 = smov 0   ;;  %s1519_s7 = smov 0  }
   0x4   :  { %s1521_s8 = smov 0   ;;  %s1523_s9 = smov 0  }
   0x5   :  { %s1525_s10 = smov 0   ;;  %s1527_s11 = smov 0  }
   0x6 LB: > { %s1308_s12 = sadd.s32 4294967295, %s1499_s11   ;;  %s1309_s13 = sadd.s32 4294967294, %s1499_s11   ;;  %s1499_s11 = sphi %s1527_s11, %s17_s11   ;;  %s1495_s10 = sphi %s1525_s10, %s2196_s10   ;;  %s1491_s9 = sphi %s1523_s9, %s2195_s9   ;;  %s1487_s8 = sphi %s1521_s8, %s2194_s8   ;;  %s1483_s7 = sphi %s1519_s7, %s2193_s7   ;;  %s1479_s6 = sphi %s1517_s6, %s2192_s6  }
   0x7   : > { %s36_s14 = sadd.s32 1, %s1495_s10  ;;  %s47_s15 = sadd.s32 1, %s1487_s8 }
   0x8   : > { %p38_p0 = scmp.ge.s32.totalorder %s36_s14, 2  ;;  %p54_p1 = scmp.ne.s32.totalorder %s1487_s8, %s1483_s7 }
   0x9   : > { %p55_p2 = scmp.eq.s32.totalorder %s1499_s11, 0  ;;  %p60_p3 = scmp.ne.s32.totalorder %s1483_s7, %s1479_s6 }
   0xa   : > { %s2198_s14 = smov (%p38_p0, %s36_s14), 0  ;;  %p61_p5 = scmp.eq.s32.totalorder %s1308_s12, 0 }
   0xb   : > { %p1558_p4 = por %p55_p2, %p54_p1  ;;  %s40_s17 = ssub.s32 %s1495_s10, %s2198_s14 }
   0xc   : > { %p88_p6 = scmp.eq.s32.totalorder %s1308_s12, 1  ;;  %p45_p7 = scmp.eq.s32.totalorder %s40_s17, 0 }
   0xd   : > { %p1564_p8 = por %p61_p5, %p60_p3  ;;  %p94_p10 = scmp.eq.s32.totalorder %s1309_s13, 1 }
   0xe   : > { %p1568_p9 = por %p88_p6, %p54_p1  ;;  %p1337_p13 = scmp.lt.s32.totalorder %s1499_s11, 2 }
   0xf   : > { %s1573_s20 = scalar_select %p45_p7, %s1487_s8, %s47_s15  }
  0x10   : > { %p1575_p11 = por %p94_p10, %p60_p3  ;;  %s114_s22 = sand.u32 1, %s1487_s8  }
  0x11   : > { %s1312_s23 = sshll.u32 %s114_s22, 11  ;;  %s1323_s24 = sshll.u32 %s1495_s10, 15 }
  0x12   : > { %s129_s27 = scalar_lea.hbm %s2184_s0, %s1323_s24  ;;  %s118_s28 = scalar_lea.vmem [#allocation2], %s1312_s23 }
  0x13   : > { %s130_s29 = sshll.u32 %s118_s28, 4  ;;  %p1588_p0 = pnand %p1337_p13, %p1558_p4  ;;  %s131_s29 = int_to_ptr.vmem [resolvable:$true] %s130_s29 }
  0x14   : > { %p1315_p1 = scmp.ge.s32.totalorder %s1499_s11, 1  ;;  %s115_s2 = scalar_lea.sflag [#allocation3], %s114_s22 }
  0x15   : > { %p1393_p2 = pneg %p1588_p0  ;;  %s1404_s3 = scalar_lea.vmem %s131_s29, 32768 }
  0x16   : > { %p1405_p3 = scmp.ne.s32.totalorder %s131_s29, %s1404_s3  ;;  %s1501_s4 = smov [#allocation2]  }
  0x17   : > { %s1409_s5 = sshll.u32 %s1501_s4, 4  ;;  %s1410_s5 = int_to_ptr.vmem [resolvable:$false] %s1409_s5 }
  0x18   : > { %p1407_p5 = pnand %p1405_p3, %p1393_p2  ;;  %s1411_s12 = scalar_lea.vmem %s1410_s5, 65536 }
  0x19   : > { %p1412_p7 = scmp.lt.s32.totalorder %s131_s29, %s1410_s5  ;;  %p1413_p10 = scmp.lt.s32.totalorder %s1411_s12, %s1404_s3 }
  0x1a   : > { %p1408_p6 = pneg %p1407_p5 }
  0x1b   : > { %p1414_p12 = por %p1413_p10, %p1412_p7 }
  0x1d   : > { %p1415_p4 = pnand %p1414_p12, %p1408_p6 }
  0x1f   : > { %1418 = shalt.err (!%p1415_p4)
}
  0x20   : > { %s1502_s13 = smov 256   ;;  %s1503_s15 = smov 16  }
  0x21   : > { %1332 = dma.hbm_to_vmem [thread:$0]  (!%p1588_p0), %s129_s27, 32768, %s131_s29, %s115_s2, %s1502_s13, %s1502_s13, %s1503_s15  }
  0x22   : > { %p138_p13 = scmp.lt.s32.totalorder %s1499_s11, 3 }
  0x24   : > { %p139_p2 = pnand %p1315_p1, %p138_p13 }
  0x25   : > { %s1601_s16 = sand.u32 (!%p139_p2), 1, %s1483_s7  }
  0x26   : > { %142 = sbr.rel (%p139_p2) target bundleno = 692 (0x2b4), region = 24  ;;  %s1316_s17 = sshll.u32 (!%p139_p2), %s1601_s16, 11 }
  0x27   : > { %s145_s22 = scalar_lea.sflag (!%p139_p2), [#allocation3], %s1601_s16  ;;  %s1607_s23 = scalar_lea.vmem (!%p139_p2), [#allocation2], %s1316_s17 }
  0x2b   : > { %1470 = dma.done.wait (%p1564_p8), %s145_s22, 32768  }
  0x2c   : > { %1472 = vsyncadd (%p1564_p8), %s145_s22, 4294934528  ;;  %v172_v0 = vld [vmem:[%s1607_s23 + $0x8] sm:$0xff]  ;;  %v171_v1 = vld [vmem:[%s1607_s23] sm:$0xff]  ;;  %s1679_s18 = scalar_lea.vmem [#allocation5], %s1316_s17  ;;  %s1324_s24 = sshll.u32 %s1491_s9, 15 }
  0x2d   : > { %459 = vxpose.xlu1.b32.start [1/16] %v172_v0, 128  ;;  %427 = vxpose.xlu0.b32.start [1/16] %v171_v1, 128  ;;  %v174_v2 = vld [vmem:[%s1607_s23 + $0x18] sm:$0xff]  ;;  %v173_v3 = vld [vmem:[%s1607_s23 + $0x10] sm:$0xff]  ;;  %v176_v4 = vld [vmem:[%s1607_s23 + $0x28] sm:$0xff]  ;;  %s1214_s25 = sshll.u32 %s1679_s18, 4  ;;  %s2132_s28 = scalar_lea.hbm %s2185_s1, %s1324_s24  ;;  %s2134_s25 = int_to_ptr.vmem [resolvable:$true] %s1214_s25 }
  0x2e   : > { %v175_v5 = vld [vmem:[%s1607_s23 + $0x20] sm:$0xff]  ;;  %v178_v6 = vld [vmem:[%s1607_s23 + $0x38] sm:$0xff]  ;;  %v177_v7 = vld [vmem:[%s1607_s23 + $0x30] sm:$0xff]  ;;  %s1196_s9 = scalar_lea.sflag [#allocation4], %s1601_s16  ;;  %s1419_s29 = scalar_lea.vmem %s2134_s25, 32768 }
  0x2f   : > { %v180_v8 = vld [vmem:[%s1607_s23 + $0x48] sm:$0xff]  ;;  %v179_v9 = vld [vmem:[%s1607_s23 + $0x40] sm:$0xff]  ;;  %v182_v10 = vld [vmem:[%s1607_s23 + $0x58] sm:$0xff]  ;;  %p1420_p8 = scmp.ne.s32.totalorder %s2134_s25, %s1419_s29  ;;  %s1504_s30 = smov [#allocation5]  }
  0x30   : > { %v181_v11 = vld [vmem:[%s1607_s23 + $0x50] sm:$0xff]  ;;  %v184_v12 = vld [vmem:[%s1607_s23 + $0x68] sm:$0xff]  ;;  %v183_v13 = vld [vmem:[%s1607_s23 + $0x60] sm:$0xff]  ;;  %s1423_s2 = sshll.u32 %s1504_s30, 4  ;;  %s1424_s2 = int_to_ptr.vmem [resolvable:$false] %s1423_s2 }
  0x31   : > { %460 = vxpose.xlu1.b32.cont [2/16] %v174_v2, 128  ;;  %428 = vxpose.xlu0.b32.cont [2/16] %v173_v3, 128  ;;  %v186_v14 = vld [vmem:[%s1607_s23 + $0x78] sm:$0xff]  ;;  %v185_v15 = vld [vmem:[%s1607_s23 + $0x70] sm:$0xff]  ;;  %v188_v16 = vld [vmem:[%s1607_s23 + $0x88] sm:$0xff]  ;;  %p1421_p12 = pnand %p1420_p8, %p1568_p9  ;;  %s1425_s3 = scalar_lea.vmem %s1424_s2, 65536 }
  0x32   : > { %v187_v17 = vld [vmem:[%s1607_s23 + $0x80] sm:$0xff]  ;;  %v190_v18 = vld [vmem:[%s1607_s23 + $0x98] sm:$0xff]  ;;  %v189_v19 = vld [vmem:[%s1607_s23 + $0x90] sm:$0xff]  ;;  %p1426_p1 = scmp.lt.s32.totalorder %s2134_s25, %s1424_s2  ;;  %p1427_p3 = scmp.lt.s32.totalorder %s1425_s3, %s1419_s29 }
  0x33   : > { %v192_v20 = vld [vmem:[%s1607_s23 + $0xa8] sm:$0xff]  ;;  %v191_v21 = vld [vmem:[%s1607_s23 + $0xa0] sm:$0xff]  ;;  %v194_v22 = vld [vmem:[%s1607_s23 + $0xb8] sm:$0xff]  ;;  %p1422_p0 = pneg %p1421_p12 }
  0x34   : > { %v193_v23 = vld [vmem:[%s1607_s23 + $0xb0] sm:$0xff]  ;;  %v196_v24 = vld [vmem:[%s1607_s23 + $0xc8] sm:$0xff]  ;;  %v195_v25 = vld [vmem:[%s1607_s23 + $0xc0] sm:$0xff]  ;;  %p1428_p5 = por %p1427_p3, %p1426_p1 }
  0x35   : > { %461 = vxpose.xlu1.b32.cont [3/16] %v176_v4, 128  ;;  %429 = vxpose.xlu0.b32.cont [3/16] %v175_v5, 128  ;;  %v198_v26 = vld [vmem:[%s1607_s23 + $0xd8] sm:$0xff]  ;;  %v197_v27 = vld [vmem:[%s1607_s23 + $0xd0] sm:$0xff]  ;;  %v200_v28 = vld [vmem:[%s1607_s23 + $0xe8] sm:$0xff] }
  0x36   : > { %v199_v29 = vld [vmem:[%s1607_s23 + $0xe0] sm:$0xff]  ;;  %v202_v30 = vld [vmem:[%s1607_s23 + $0xf8] sm:$0xff]  ;;  %v201_v31 = vld [vmem:[%s1607_s23 + $0xf0] sm:$0xff]  ;;  %p1429_p6 = pnand %p1428_p5, %p1422_p0 }
  0x37   : > { %v204_v32 = vld [vmem:[%s1607_s23 + $0x108] sm:$0xff]  ;;  %v203_v33 = vld [vmem:[%s1607_s23 + $0x100] sm:$0xff]  ;;  %v206_v34 = vld [vmem:[%s1607_s23 + $0x118] sm:$0xff] }
  0x38   : > { %v205_v35 = vld [vmem:[%s1607_s23 + $0x110] sm:$0xff]  ;;  %v208_v36 = vld [vmem:[%s1607_s23 + $0x128] sm:$0xff]  ;;  %v207_v37 = vld [vmem:[%s1607_s23 + $0x120] sm:$0xff] }
  0x39   : > { %462 = vxpose.xlu1.b32.cont [4/16] %v178_v6, 128  ;;  %430 = vxpose.xlu0.b32.cont [4/16] %v177_v7, 128  ;;  %v210_v38 = vld [vmem:[%s1607_s23 + $0x138] sm:$0xff]  ;;  %v209_v39 = vld [vmem:[%s1607_s23 + $0x130] sm:$0xff]  ;;  %v212_v40 = vld [vmem:[%s1607_s23 + $0x148] sm:$0xff] }
  0x3a   : > { %v211_v41 = vld [vmem:[%s1607_s23 + $0x140] sm:$0xff]  ;;  %v214_v42 = vld [vmem:[%s1607_s23 + $0x158] sm:$0xff]  ;;  %v213_v43 = vld [vmem:[%s1607_s23 + $0x150] sm:$0xff] }
  0x3b   : > { %v216_v44 = vld [vmem:[%s1607_s23 + $0x168] sm:$0xff]  ;;  %v215_v45 = vld [vmem:[%s1607_s23 + $0x160] sm:$0xff]  ;;  %v218_v46 = vld [vmem:[%s1607_s23 + $0x178] sm:$0xff] }
  0x3c   : > { %v217_v47 = vld [vmem:[%s1607_s23 + $0x170] sm:$0xff]  ;;  %v220_v48 = vld [vmem:[%s1607_s23 + $0x188] sm:$0xff]  ;;  %v219_v49 = vld [vmem:[%s1607_s23 + $0x180] sm:$0xff] }
  0x3d   : > { %463 = vxpose.xlu1.b32.cont [5/16] %v180_v8, 128  ;;  %431 = vxpose.xlu0.b32.cont [5/16] %v179_v9, 128  ;;  %v222_v50 = vld [vmem:[%s1607_s23 + $0x198] sm:$0xff]  ;;  %v221_v51 = vld [vmem:[%s1607_s23 + $0x190] sm:$0xff]  ;;  %v224_v52 = vld [vmem:[%s1607_s23 + $0x1a8] sm:$0xff] }
  0x3e   : > { %v223_v53 = vld [vmem:[%s1607_s23 + $0x1a0] sm:$0xff]  ;;  %v226_v54 = vld [vmem:[%s1607_s23 + $0x1b8] sm:$0xff]  ;;  %v225_v55 = vld [vmem:[%s1607_s23 + $0x1b0] sm:$0xff] }
  0x3f   : > { %v228_v56 = vld [vmem:[%s1607_s23 + $0x1c8] sm:$0xff]  ;;  %v227_v57 = vld [vmem:[%s1607_s23 + $0x1c0] sm:$0xff]  ;;  %v230_v58 = vld [vmem:[%s1607_s23 + $0x1d8] sm:$0xff] }
  0x40   : > { %v229_v59 = vld [vmem:[%s1607_s23 + $0x1d0] sm:$0xff]  ;;  %v232_v60 = vld [vmem:[%s1607_s23 + $0x1e8] sm:$0xff]  ;;  %v231_v61 = vld [vmem:[%s1607_s23 + $0x1e0] sm:$0xff] }
  0x41   : > { %464 = vxpose.xlu1.b32.cont [6/16] %v182_v10, 128  ;;  %432 = vxpose.xlu0.b32.cont [6/16] %v181_v11, 128  ;;  %v234_v62 = vld [vmem:[%s1607_s23 + $0x1f8] sm:$0xff]  ;;  %v233_v63 = vld [vmem:[%s1607_s23 + $0x1f0] sm:$0xff]  ;;  %v236_v2 = vld [vmem:[%s1607_s23 + $0x208] sm:$0xff] }
  0x42   : > { %v235_v3 = vld [vmem:[%s1607_s23 + $0x200] sm:$0xff]  ;;  %v238_v6 = vld [vmem:[%s1607_s23 + $0x218] sm:$0xff]  ;;  %v237_v7 = vld [vmem:[%s1607_s23 + $0x210] sm:$0xff] }
  0x43   : > { %v240_v10 = vld [vmem:[%s1607_s23 + $0x228] sm:$0xff]  ;;  %v239_v11 = vld [vmem:[%s1607_s23 + $0x220] sm:$0xff] }
  0x45   : > { %465 = vxpose.xlu1.b32.cont [7/16] %v184_v12, 128  ;;  %433 = vxpose.xlu0.b32.cont [7/16] %v183_v13, 128 }
  0x49   : > { %466 = vxpose.xlu1.b32.cont [8/16] %v186_v14, 128  ;;  %434 = vxpose.xlu0.b32.cont [8/16] %v185_v15, 128  ;;  %v242_v14 = vld [vmem:[%s1607_s23 + $0x238] sm:$0xff]  ;;  %v241_v15 = vld [vmem:[%s1607_s23 + $0x230] sm:$0xff] }
  0x4d   : > { %467 = vxpose.xlu1.b32.cont [9/16] %v188_v16, 128  ;;  %435 = vxpose.xlu0.b32.cont [9/16] %v187_v17, 128 }
  0x51   : > { %468 = vxpose.xlu1.b32.cont [10/16] %v190_v18, 128  ;;  %436 = vxpose.xlu0.b32.cont [10/16] %v189_v19, 128  ;;  %v244_v18 = vld [vmem:[%s1607_s23 + $0x248] sm:$0xff]  ;;  %v243_v19 = vld [vmem:[%s1607_s23 + $0x240] sm:$0xff] }
  0x55   : > { %469 = vxpose.xlu1.b32.cont [11/16] %v192_v20, 128  ;;  %437 = vxpose.xlu0.b32.cont [11/16] %v191_v21, 128 }
  0x59   : > { %470 = vxpose.xlu1.b32.cont [12/16] %v194_v22, 128  ;;  %438 = vxpose.xlu0.b32.cont [12/16] %v193_v23, 128  ;;  %v246_v22 = vld [vmem:[%s1607_s23 + $0x258] sm:$0xff]  ;;  %v245_v23 = vld [vmem:[%s1607_s23 + $0x250] sm:$0xff] }
  0x5d   : > { %471 = vxpose.xlu1.b32.cont [13/16] %v196_v24, 128  ;;  %439 = vxpose.xlu0.b32.cont [13/16] %v195_v25, 128 }
  0x61   : > { %472 = vxpose.xlu1.b32.cont [14/16] %v198_v26, 128  ;;  %440 = vxpose.xlu0.b32.cont [14/16] %v197_v27, 128  ;;  %v248_v26 = vld [vmem:[%s1607_s23 + $0x268] sm:$0xff]  ;;  %v247_v27 = vld [vmem:[%s1607_s23 + $0x260] sm:$0xff] }
  0x65   : > { %473 = vxpose.xlu1.b32.cont [15/16] %v200_v28, 128  ;;  %441 = vxpose.xlu0.b32.cont [15/16] %v199_v29, 128 }
  0x69   : > { %474 = vxpose.xlu1.b32.end [16/16] %v202_v30, 128  ;;  %442 = vxpose.xlu0.b32.end [16/16] %v201_v31, 128  ;;  %v250_v30 = vld [vmem:[%s1607_s23 + $0x278] sm:$0xff]  ;;  %v249_v31 = vld [vmem:[%s1607_s23 + $0x270] sm:$0xff] }
  0x6d   : > { %523 = vxpose.xlu1.b32.start [1/16] %v204_v32, 128  ;;  %491 = vxpose.xlu0.b32.start [1/16] %v203_v33, 128 }
  0x71   : > { %524 = vxpose.xlu1.b32.cont [2/16] %v206_v34, 128  ;;  %492 = vxpose.xlu0.b32.cont [2/16] %v205_v35, 128  ;;  %v252_v34 = vld [vmem:[%s1607_s23 + $0x288] sm:$0xff]  ;;  %v251_v35 = vld [vmem:[%s1607_s23 + $0x280] sm:$0xff] }
  0x75   : > { %525 = vxpose.xlu1.b32.cont [3/16] %v208_v36, 128  ;;  %493 = vxpose.xlu0.b32.cont [3/16] %v207_v37, 128 }
  0x79   : > { %526 = vxpose.xlu1.b32.cont [4/16] %v210_v38, 128  ;;  %494 = vxpose.xlu0.b32.cont [4/16] %v209_v39, 128  ;;  %v254_v38 = vld [vmem:[%s1607_s23 + $0x298] sm:$0xff]  ;;  %v253_v39 = vld [vmem:[%s1607_s23 + $0x290] sm:$0xff] }
  0x7d   : > { %527 = vxpose.xlu1.b32.cont [5/16] %v212_v40, 128  ;;  %495 = vxpose.xlu0.b32.cont [5/16] %v211_v41, 128 }
  0x81   : > { %528 = vxpose.xlu1.b32.cont [6/16] %v214_v42, 128  ;;  %496 = vxpose.xlu0.b32.cont [6/16] %v213_v43, 128  ;;  %v256_v42 = vld [vmem:[%s1607_s23 + $0x2a8] sm:$0xff]  ;;  %v255_v43 = vld [vmem:[%s1607_s23 + $0x2a0] sm:$0xff] }
  0x85   : > { %529 = vxpose.xlu1.b32.cont [7/16] %v216_v44, 128  ;;  %497 = vxpose.xlu0.b32.cont [7/16] %v215_v45, 128 }
  0x89   : > { %530 = vxpose.xlu1.b32.cont [8/16] %v218_v46, 128  ;;  %498 = vxpose.xlu0.b32.cont [8/16] %v217_v47, 128  ;;  %v258_v46 = vld [vmem:[%s1607_s23 + $0x2b8] sm:$0xff]  ;;  %v257_v47 = vld [vmem:[%s1607_s23 + $0x2b0] sm:$0xff] }
  0x8d   : > { %531 = vxpose.xlu1.b32.cont [9/16] %v220_v48, 128  ;;  %499 = vxpose.xlu0.b32.cont [9/16] %v219_v49, 128 }
  0x91   : > { %532 = vxpose.xlu1.b32.cont [10/16] %v222_v50, 128  ;;  %500 = vxpose.xlu0.b32.cont [10/16] %v221_v51, 128  ;;  %v260_v50 = vld [vmem:[%s1607_s23 + $0x2c8] sm:$0xff]  ;;  %v259_v51 = vld [vmem:[%s1607_s23 + $0x2c0] sm:$0xff] }
  0x95   : > { %533 = vxpose.xlu1.b32.cont [11/16] %v224_v52, 128  ;;  %501 = vxpose.xlu0.b32.cont [11/16] %v223_v53, 128 }
  0x99   : > { %534 = vxpose.xlu1.b32.cont [12/16] %v226_v54, 128  ;;  %502 = vxpose.xlu0.b32.cont [12/16] %v225_v55, 128  ;;  %v262_v54 = vld [vmem:[%s1607_s23 + $0x2d8] sm:$0xff]  ;;  %v261_v55 = vld [vmem:[%s1607_s23 + $0x2d0] sm:$0xff] }
  0x9d   : > { %535 = vxpose.xlu1.b32.cont [13/16] %v228_v56, 128  ;;  %503 = vxpose.xlu0.b32.cont [13/16] %v227_v57, 128 }
  0xa1   : > { %536 = vxpose.xlu1.b32.cont [14/16] %v230_v58, 128  ;;  %504 = vxpose.xlu0.b32.cont [14/16] %v229_v59, 128  ;;  %v264_v58 = vld [vmem:[%s1607_s23 + $0x2e8] sm:$0xff]  ;;  %v263_v59 = vld [vmem:[%s1607_s23 + $0x2e0] sm:$0xff] }
  0xa5   : > { %537 = vxpose.xlu1.b32.cont [15/16] %v232_v60, 128  ;;  %505 = vxpose.xlu0.b32.cont [15/16] %v231_v61, 128 }
  0xa9   : > { %538 = vxpose.xlu1.b32.end [16/16] %v234_v62, 128  ;;  %v475_v0 = vpop.trf.xlu1  ;;  %506 = vxpose.xlu0.b32.end [16/16] %v233_v63, 128  ;;  %v443_v1 = vpop.trf.xlu0  ;;  %v266_v62 = vld [vmem:[%s1607_s23 + $0x2f8] sm:$0xff]  ;;  %v265_v63 = vld [vmem:[%s1607_s23 + $0x2f0] sm:$0xff] }
  0xaa   : > { %1067 = vst [vmem:[%s1679_s18 + $0x400] sm:$0xff] %v475_v0  ;;  %939 = vst [vmem:[%s1679_s18] sm:$0xff] %v443_v1 }
  0xad   : > { %587 = vxpose.xlu1.b32.start [1/16] %v236_v2, 128  ;;  %v476_v4 = vpop.trf.xlu1  ;;  %555 = vxpose.xlu0.b32.start [1/16] %v235_v3, 128  ;;  %v444_v5 = vpop.trf.xlu0  ;;  %v268_v2 = vld [vmem:[%s1607_s23 + $0x308] sm:$0xff]  ;;  %v267_v3 = vld [vmem:[%s1607_s23 + $0x300] sm:$0xff] }
  0xae   : > { %1075 = vst [vmem:[%s1679_s18 + $0x440] sm:$0xff] %v476_v4  ;;  %947 = vst [vmem:[%s1679_s18 + $0x40] sm:$0xff] %v444_v5 }
  0xb1   : > { %588 = vxpose.xlu1.b32.cont [2/16] %v238_v6, 128  ;;  %v477_v8 = vpop.trf.xlu1  ;;  %556 = vxpose.xlu0.b32.cont [2/16] %v237_v7, 128  ;;  %v445_v9 = vpop.trf.xlu0  ;;  %v270_v6 = vld [vmem:[%s1607_s23 + $0x318] sm:$0xff]  ;;  %v269_v7 = vld [vmem:[%s1607_s23 + $0x310] sm:$0xff] }
  0xb2   : > { %1083 = vst [vmem:[%s1679_s18 + $0x480] sm:$0xff] %v477_v8  ;;  %955 = vst [vmem:[%s1679_s18 + $0x80] sm:$0xff] %v445_v9 }
  0xb5   : > { %589 = vxpose.xlu1.b32.cont [3/16] %v240_v10, 128  ;;  %v478_v12 = vpop.trf.xlu1  ;;  %557 = vxpose.xlu0.b32.cont [3/16] %v239_v11, 128  ;;  %v446_v13 = vpop.trf.xlu0  ;;  %v272_v10 = vld [vmem:[%s1607_s23 + $0x328] sm:$0xff]  ;;  %v271_v11 = vld [vmem:[%s1607_s23 + $0x320] sm:$0xff] }
  0xb6   : > { %1091 = vst [vmem:[%s1679_s18 + $0x4c0] sm:$0xff] %v478_v12  ;;  %963 = vst [vmem:[%s1679_s18 + $0xc0] sm:$0xff] %v446_v13 }
  0xb9   : > { %590 = vxpose.xlu1.b32.cont [4/16] %v242_v14, 128  ;;  %v479_v16 = vpop.trf.xlu1  ;;  %558 = vxpose.xlu0.b32.cont [4/16] %v241_v15, 128  ;;  %v447_v17 = vpop.trf.xlu0  ;;  %v274_v14 = vld [vmem:[%s1607_s23 + $0x338] sm:$0xff]  ;;  %v273_v15 = vld [vmem:[%s1607_s23 + $0x330] sm:$0xff] }
  0xba   : > { %1099 = vst [vmem:[%s1679_s18 + $0x500] sm:$0xff] %v479_v16  ;;  %971 = vst [vmem:[%s1679_s18 + $0x100] sm:$0xff] %v447_v17 }
  0xbd   : > { %591 = vxpose.xlu1.b32.cont [5/16] %v244_v18, 128  ;;  %v480_v20 = vpop.trf.xlu1  ;;  %559 = vxpose.xlu0.b32.cont [5/16] %v243_v19, 128  ;;  %v448_v21 = vpop.trf.xlu0  ;;  %v276_v18 = vld [vmem:[%s1607_s23 + $0x348] sm:$0xff]  ;;  %v275_v19 = vld [vmem:[%s1607_s23 + $0x340] sm:$0xff] }
  0xbe   : > { %1107 = vst [vmem:[%s1679_s18 + $0x540] sm:$0xff] %v480_v20  ;;  %979 = vst [vmem:[%s1679_s18 + $0x140] sm:$0xff] %v448_v21 }
  0xc1   : > { %592 = vxpose.xlu1.b32.cont [6/16] %v246_v22, 128  ;;  %v481_v24 = vpop.trf.xlu1  ;;  %560 = vxpose.xlu0.b32.cont [6/16] %v245_v23, 128  ;;  %v449_v25 = vpop.trf.xlu0  ;;  %v278_v22 = vld [vmem:[%s1607_s23 + $0x358] sm:$0xff]  ;;  %v277_v23 = vld [vmem:[%s1607_s23 + $0x350] sm:$0xff] }
  0xc2   : > { %1115 = vst [vmem:[%s1679_s18 + $0x580] sm:$0xff] %v481_v24  ;;  %987 = vst [vmem:[%s1679_s18 + $0x180] sm:$0xff] %v449_v25 }
  0xc5   : > { %593 = vxpose.xlu1.b32.cont [7/16] %v248_v26, 128  ;;  %v482_v28 = vpop.trf.xlu1  ;;  %561 = vxpose.xlu0.b32.cont [7/16] %v247_v27, 128  ;;  %v450_v29 = vpop.trf.xlu0  ;;  %v280_v26 = vld [vmem:[%s1607_s23 + $0x368] sm:$0xff]  ;;  %v279_v27 = vld [vmem:[%s1607_s23 + $0x360] sm:$0xff] }
  0xc6   : > { %1123 = vst [vmem:[%s1679_s18 + $0x5c0] sm:$0xff] %v482_v28  ;;  %995 = vst [vmem:[%s1679_s18 + $0x1c0] sm:$0xff] %v450_v29 }
  0xc9   : > { %594 = vxpose.xlu1.b32.cont [8/16] %v250_v30, 128  ;;  %v483_v32 = vpop.trf.xlu1  ;;  %562 = vxpose.xlu0.b32.cont [8/16] %v249_v31, 128  ;;  %v451_v33 = vpop.trf.xlu0  ;;  %v282_v30 = vld [vmem:[%s1607_s23 + $0x378] sm:$0xff]  ;;  %v281_v31 = vld [vmem:[%s1607_s23 + $0x370] sm:$0xff] }
  0xca   : > { %1131 = vst [vmem:[%s1679_s18 + $0x600] sm:$0xff] %v483_v32  ;;  %1003 = vst [vmem:[%s1679_s18 + $0x200] sm:$0xff] %v451_v33 }
  0xcd   : > { %595 = vxpose.xlu1.b32.cont [9/16] %v252_v34, 128  ;;  %v484_v36 = vpop.trf.xlu1  ;;  %563 = vxpose.xlu0.b32.cont [9/16] %v251_v35, 128  ;;  %v452_v37 = vpop.trf.xlu0  ;;  %v284_v34 = vld [vmem:[%s1607_s23 + $0x388] sm:$0xff]  ;;  %v283_v35 = vld [vmem:[%s1607_s23 + $0x380] sm:$0xff] }
  0xce   : > { %1139 = vst [vmem:[%s1679_s18 + $0x640] sm:$0xff] %v484_v36  ;;  %1011 = vst [vmem:[%s1679_s18 + $0x240] sm:$0xff] %v452_v37 }
  0xd1   : > { %596 = vxpose.xlu1.b32.cont [10/16] %v254_v38, 128  ;;  %v485_v40 = vpop.trf.xlu1  ;;  %564 = vxpose.xlu0.b32.cont [10/16] %v253_v39, 128  ;;  %v453_v41 = vpop.trf.xlu0  ;;  %v286_v38 = vld [vmem:[%s1607_s23 + $0x398] sm:$0xff]  ;;  %v285_v39 = vld [vmem:[%s1607_s23 + $0x390] sm:$0xff] }
  0xd2   : > { %1147 = vst [vmem:[%s1679_s18 + $0x680] sm:$0xff] %v485_v40  ;;  %1019 = vst [vmem:[%s1679_s18 + $0x280] sm:$0xff] %v453_v41 }
  0xd5   : > { %597 = vxpose.xlu1.b32.cont [11/16] %v256_v42, 128  ;;  %v486_v44 = vpop.trf.xlu1  ;;  %565 = vxpose.xlu0.b32.cont [11/16] %v255_v43, 128  ;;  %v454_v45 = vpop.trf.xlu0  ;;  %v288_v42 = vld [vmem:[%s1607_s23 + $0x3a8] sm:$0xff]  ;;  %v287_v43 = vld [vmem:[%s1607_s23 + $0x3a0] sm:$0xff] }
  0xd6   : > { %1155 = vst [vmem:[%s1679_s18 + $0x6c0] sm:$0xff] %v486_v44  ;;  %1027 = vst [vmem:[%s1679_s18 + $0x2c0] sm:$0xff] %v454_v45 }
  0xd9   : > { %598 = vxpose.xlu1.b32.cont [12/16] %v258_v46, 128  ;;  %v487_v48 = vpop.trf.xlu1  ;;  %566 = vxpose.xlu0.b32.cont [12/16] %v257_v47, 128  ;;  %v455_v49 = vpop.trf.xlu0  ;;  %v290_v46 = vld [vmem:[%s1607_s23 + $0x3b8] sm:$0xff]  ;;  %v289_v47 = vld [vmem:[%s1607_s23 + $0x3b0] sm:$0xff] }
  0xda   : > { %1163 = vst [vmem:[%s1679_s18 + $0x700] sm:$0xff] %v487_v48  ;;  %1035 = vst [vmem:[%s1679_s18 + $0x300] sm:$0xff] %v455_v49 }
  0xdd   : > { %599 = vxpose.xlu1.b32.cont [13/16] %v260_v50, 128  ;;  %v488_v52 = vpop.trf.xlu1  ;;  %567 = vxpose.xlu0.b32.cont [13/16] %v259_v51, 128  ;;  %v456_v53 = vpop.trf.xlu0  ;;  %v292_v50 = vld [vmem:[%s1607_s23 + $0x3c8] sm:$0xff]  ;;  %v291_v51 = vld [vmem:[%s1607_s23 + $0x3c0] sm:$0xff] }
  0xde   : > { %1171 = vst [vmem:[%s1679_s18 + $0x740] sm:$0xff] %v488_v52  ;;  %1043 = vst [vmem:[%s1679_s18 + $0x340] sm:$0xff] %v456_v53 }
  0xe1   : > { %600 = vxpose.xlu1.b32.cont [14/16] %v262_v54, 128  ;;  %v489_v56 = vpop.trf.xlu1  ;;  %568 = vxpose.xlu0.b32.cont [14/16] %v261_v55, 128  ;;  %v457_v57 = vpop.trf.xlu0  ;;  %v294_v54 = vld [vmem:[%s1607_s23 + $0x3d8] sm:$0xff]  ;;  %v293_v55 = vld [vmem:[%s1607_s23 + $0x3d0] sm:$0xff] }
  0xe2   : > { %1179 = vst [vmem:[%s1679_s18 + $0x780] sm:$0xff] %v489_v56  ;;  %1051 = vst [vmem:[%s1679_s18 + $0x380] sm:$0xff] %v457_v57 }
  0xe5   : > { %601 = vxpose.xlu1.b32.cont [15/16] %v264_v58, 128  ;;  %v490_v60 = vpop.trf.xlu1  ;;  %569 = vxpose.xlu0.b32.cont [15/16] %v263_v59, 128  ;;  %v458_v61 = vpop.trf.xlu0  ;;  %v296_v58 = vld [vmem:[%s1607_s23 + $0x3e8] sm:$0xff]  ;;  %v295_v59 = vld [vmem:[%s1607_s23 + $0x3e0] sm:$0xff] }
  0xe6   : > { %1187 = vst [vmem:[%s1679_s18 + $0x7c0] sm:$0xff] %v490_v60  ;;  %1059 = vst [vmem:[%s1679_s18 + $0x3c0] sm:$0xff] %v458_v61 }
  0xe9   : > { %602 = vxpose.xlu1.b32.end [16/16] %v266_v62, 128  ;;  %v539_v0 = vpop.trf.xlu1  ;;  %570 = vxpose.xlu0.b32.end [16/16] %v265_v63, 128  ;;  %v507_v1 = vpop.trf.xlu0  ;;  %v298_v62 = vld [vmem:[%s1607_s23 + $0x3f8] sm:$0xff]  ;;  %v297_v63 = vld [vmem:[%s1607_s23 + $0x3f0] sm:$0xff] }
  0xea   : > { %1068 = vst [vmem:[%s1679_s18 + $0x408] sm:$0xff] %v539_v0  ;;  %940 = vst [vmem:[%s1679_s18 + $0x8] sm:$0xff] %v507_v1 }
  0xed   : > { %651 = vxpose.xlu1.b32.start [1/16] %v268_v2, 128  ;;  %v540_v4 = vpop.trf.xlu1  ;;  %619 = vxpose.xlu0.b32.start [1/16] %v267_v3, 128  ;;  %v508_v5 = vpop.trf.xlu0  ;;  %v300_v2 = vld [vmem:[%s1607_s23 + $0x408] sm:$0xff]  ;;  %v299_v3 = vld [vmem:[%s1607_s23 + $0x400] sm:$0xff] }
  0xee   : > { %1076 = vst [vmem:[%s1679_s18 + $0x448] sm:$0xff] %v540_v4  ;;  %948 = vst [vmem:[%s1679_s18 + $0x48] sm:$0xff] %v508_v5 }
  0xf1   : > { %652 = vxpose.xlu1.b32.cont [2/16] %v270_v6, 128  ;;  %v541_v8 = vpop.trf.xlu1  ;;  %620 = vxpose.xlu0.b32.cont [2/16] %v269_v7, 128  ;;  %v509_v9 = vpop.trf.xlu0  ;;  %v302_v6 = vld [vmem:[%s1607_s23 + $0x418] sm:$0xff]  ;;  %v301_v7 = vld [vmem:[%s1607_s23 + $0x410] sm:$0xff] }
  0xf2   : > { %1084 = vst [vmem:[%s1679_s18 + $0x488] sm:$0xff] %v541_v8  ;;  %956 = vst [vmem:[%s1679_s18 + $0x88] sm:$0xff] %v509_v9 }
  0xf5   : > { %653 = vxpose.xlu1.b32.cont [3/16] %v272_v10, 128  ;;  %v542_v12 = vpop.trf.xlu1  ;;  %621 = vxpose.xlu0.b32.cont [3/16] %v271_v11, 128  ;;  %v510_v13 = vpop.trf.xlu0  ;;  %v304_v10 = vld [vmem:[%s1607_s23 + $0x428] sm:$0xff]  ;;  %v303_v11 = vld [vmem:[%s1607_s23 + $0x420] sm:$0xff] }
  0xf6   : > { %1092 = vst [vmem:[%s1679_s18 + $0x4c8] sm:$0xff] %v542_v12  ;;  %964 = vst [vmem:[%s1679_s18 + $0xc8] sm:$0xff] %v510_v13 }
  0xf9   : > { %654 = vxpose.xlu1.b32.cont [4/16] %v274_v14, 128  ;;  %v543_v16 = vpop.trf.xlu1  ;;  %622 = vxpose.xlu0.b32.cont [4/16] %v273_v15, 128  ;;  %v511_v17 = vpop.trf.xlu0  ;;  %v306_v14 = vld [vmem:[%s1607_s23 + $0x438] sm:$0xff]  ;;  %v305_v15 = vld [vmem:[%s1607_s23 + $0x430] sm:$0xff] }
  0xfa   : > { %1100 = vst [vmem:[%s1679_s18 + $0x508] sm:$0xff] %v543_v16  ;;  %972 = vst [vmem:[%s1679_s18 + $0x108] sm:$0xff] %v511_v17 }
  0xfd   : > { %655 = vxpose.xlu1.b32.cont [5/16] %v276_v18, 128  ;;  %v544_v20 = vpop.trf.xlu1  ;;  %623 = vxpose.xlu0.b32.cont [5/16] %v275_v19, 128  ;;  %v512_v21 = vpop.trf.xlu0  ;;  %v308_v18 = vld [vmem:[%s1607_s23 + $0x448] sm:$0xff]  ;;  %v307_v19 = vld [vmem:[%s1607_s23 + $0x440] sm:$0xff] }
  0xfe   : > { %1108 = vst [vmem:[%s1679_s18 + $0x548] sm:$0xff] %v544_v20  ;;  %980 = vst [vmem:[%s1679_s18 + $0x148] sm:$0xff] %v512_v21 }
 0x101   : > { %656 = vxpose.xlu1.b32.cont [6/16] %v278_v22, 128  ;;  %v545_v24 = vpop.trf.xlu1  ;;  %624 = vxpose.xlu0.b32.cont [6/16] %v277_v23, 128  ;;  %v513_v25 = vpop.trf.xlu0  ;;  %v310_v22 = vld [vmem:[%s1607_s23 + $0x458] sm:$0xff]  ;;  %v309_v23 = vld [vmem:[%s1607_s23 + $0x450] sm:$0xff] }
 0x102   : > { %1116 = vst [vmem:[%s1679_s18 + $0x588] sm:$0xff] %v545_v24  ;;  %988 = vst [vmem:[%s1679_s18 + $0x188] sm:$0xff] %v513_v25 }
 0x105   : > { %657 = vxpose.xlu1.b32.cont [7/16] %v280_v26, 128  ;;  %v546_v28 = vpop.trf.xlu1  ;;  %625 = vxpose.xlu0.b32.cont [7/16] %v279_v27, 128  ;;  %v514_v29 = vpop.trf.xlu0  ;;  %v312_v26 = vld [vmem:[%s1607_s23 + $0x468] sm:$0xff]  ;;  %v311_v27 = vld [vmem:[%s1607_s23 + $0x460] sm:$0xff] }
 0x106   : > { %1124 = vst [vmem:[%s1679_s18 + $0x5c8] sm:$0xff] %v546_v28  ;;  %996 = vst [vmem:[%s1679_s18 + $0x1c8] sm:$0xff] %v514_v29 }
 0x109   : > { %658 = vxpose.xlu1.b32.cont [8/16] %v282_v30, 128  ;;  %v547_v32 = vpop.trf.xlu1  ;;  %626 = vxpose.xlu0.b32.cont [8/16] %v281_v31, 128  ;;  %v515_v33 = vpop.trf.xlu0  ;;  %v314_v30 = vld [vmem:[%s1607_s23 + $0x478] sm:$0xff]  ;;  %v313_v31 = vld [vmem:[%s1607_s23 + $0x470] sm:$0xff] }
 0x10a   : > { %1132 = vst [vmem:[%s1679_s18 + $0x608] sm:$0xff] %v547_v32  ;;  %1004 = vst [vmem:[%s1679_s18 + $0x208] sm:$0xff] %v515_v33 }
 0x10d   : > { %659 = vxpose.xlu1.b32.cont [9/16] %v284_v34, 128  ;;  %v548_v36 = vpop.trf.xlu1  ;;  %627 = vxpose.xlu0.b32.cont [9/16] %v283_v35, 128  ;;  %v516_v37 = vpop.trf.xlu0  ;;  %v316_v34 = vld [vmem:[%s1607_s23 + $0x488] sm:$0xff]  ;;  %v315_v35 = vld [vmem:[%s1607_s23 + $0x480] sm:$0xff] }
 0x10e   : > { %1140 = vst [vmem:[%s1679_s18 + $0x648] sm:$0xff] %v548_v36  ;;  %1012 = vst [vmem:[%s1679_s18 + $0x248] sm:$0xff] %v516_v37 }
 0x111   : > { %660 = vxpose.xlu1.b32.cont [10/16] %v286_v38, 128  ;;  %v549_v40 = vpop.trf.xlu1  ;;  %628 = vxpose.xlu0.b32.cont [10/16] %v285_v39, 128  ;;  %v517_v41 = vpop.trf.xlu0  ;;  %v318_v38 = vld [vmem:[%s1607_s23 + $0x498] sm:$0xff]  ;;  %v317_v39 = vld [vmem:[%s1607_s23 + $0x490] sm:$0xff] }
 0x112   : > { %1148 = vst [vmem:[%s1679_s18 + $0x688] sm:$0xff] %v549_v40  ;;  %1020 = vst [vmem:[%s1679_s18 + $0x288] sm:$0xff] %v517_v41 }
 0x115   : > { %661 = vxpose.xlu1.b32.cont [11/16] %v288_v42, 128  ;;  %v550_v44 = vpop.trf.xlu1  ;;  %629 = vxpose.xlu0.b32.cont [11/16] %v287_v43, 128  ;;  %v518_v45 = vpop.trf.xlu0  ;;  %v320_v42 = vld [vmem:[%s1607_s23 + $0x4a8] sm:$0xff]  ;;  %v319_v43 = vld [vmem:[%s1607_s23 + $0x4a0] sm:$0xff] }
 0x116   : > { %1156 = vst [vmem:[%s1679_s18 + $0x6c8] sm:$0xff] %v550_v44  ;;  %1028 = vst [vmem:[%s1679_s18 + $0x2c8] sm:$0xff] %v518_v45 }
 0x119   : > { %662 = vxpose.xlu1.b32.cont [12/16] %v290_v46, 128  ;;  %v551_v48 = vpop.trf.xlu1  ;;  %630 = vxpose.xlu0.b32.cont [12/16] %v289_v47, 128  ;;  %v519_v49 = vpop.trf.xlu0  ;;  %v322_v46 = vld [vmem:[%s1607_s23 + $0x4b8] sm:$0xff]  ;;  %v321_v47 = vld [vmem:[%s1607_s23 + $0x4b0] sm:$0xff] }
 0x11a   : > { %1164 = vst [vmem:[%s1679_s18 + $0x708] sm:$0xff] %v551_v48  ;;  %1036 = vst [vmem:[%s1679_s18 + $0x308] sm:$0xff] %v519_v49 }
 0x11d   : > { %663 = vxpose.xlu1.b32.cont [13/16] %v292_v50, 128  ;;  %v552_v52 = vpop.trf.xlu1  ;;  %631 = vxpose.xlu0.b32.cont [13/16] %v291_v51, 128  ;;  %v520_v53 = vpop.trf.xlu0  ;;  %v324_v50 = vld [vmem:[%s1607_s23 + $0x4c8] sm:$0xff]  ;;  %v323_v51 = vld [vmem:[%s1607_s23 + $0x4c0] sm:$0xff] }
 0x11e   : > { %1172 = vst [vmem:[%s1679_s18 + $0x748] sm:$0xff] %v552_v52  ;;  %1044 = vst [vmem:[%s1679_s18 + $0x348] sm:$0xff] %v520_v53 }
 0x121   : > { %664 = vxpose.xlu1.b32.cont [14/16] %v294_v54, 128  ;;  %v553_v56 = vpop.trf.xlu1  ;;  %632 = vxpose.xlu0.b32.cont [14/16] %v293_v55, 128  ;;  %v521_v57 = vpop.trf.xlu0  ;;  %v326_v54 = vld [vmem:[%s1607_s23 + $0x4d8] sm:$0xff]  ;;  %v325_v55 = vld [vmem:[%s1607_s23 + $0x4d0] sm:$0xff] }
 0x122   : > { %1180 = vst [vmem:[%s1679_s18 + $0x788] sm:$0xff] %v553_v56  ;;  %1052 = vst [vmem:[%s1679_s18 + $0x388] sm:$0xff] %v521_v57 }
 0x125   : > { %665 = vxpose.xlu1.b32.cont [15/16] %v296_v58, 128  ;;  %v554_v60 = vpop.trf.xlu1  ;;  %633 = vxpose.xlu0.b32.cont [15/16] %v295_v59, 128  ;;  %v522_v61 = vpop.trf.xlu0  ;;  %v328_v58 = vld [vmem:[%s1607_s23 + $0x4e8] sm:$0xff]  ;;  %v327_v59 = vld [vmem:[%s1607_s23 + $0x4e0] sm:$0xff] }
 0x126   : > { %1188 = vst [vmem:[%s1679_s18 + $0x7c8] sm:$0xff] %v554_v60  ;;  %1060 = vst [vmem:[%s1679_s18 + $0x3c8] sm:$0xff] %v522_v61 }
 0x129   : > { %666 = vxpose.xlu1.b32.end [16/16] %v298_v62, 128  ;;  %v603_v0 = vpop.trf.xlu1  ;;  %634 = vxpose.xlu0.b32.end [16/16] %v297_v63, 128  ;;  %v571_v1 = vpop.trf.xlu0  ;;  %v330_v62 = vld [vmem:[%s1607_s23 + $0x4f8] sm:$0xff]  ;;  %v329_v63 = vld [vmem:[%s1607_s23 + $0x4f0] sm:$0xff] }
 0x12a   : > { %1069 = vst [vmem:[%s1679_s18 + $0x410] sm:$0xff] %v603_v0  ;;  %941 = vst [vmem:[%s1679_s18 + $0x10] sm:$0xff] %v571_v1 }
 0x12d   : > { %715 = vxpose.xlu1.b32.start [1/16] %v300_v2, 128  ;;  %v604_v4 = vpop.trf.xlu1  ;;  %683 = vxpose.xlu0.b32.start [1/16] %v299_v3, 128  ;;  %v572_v5 = vpop.trf.xlu0  ;;  %v332_v2 = vld [vmem:[%s1607_s23 + $0x508] sm:$0xff]  ;;  %v331_v3 = vld [vmem:[%s1607_s23 + $0x500] sm:$0xff] }
 0x12e   : > { %1077 = vst [vmem:[%s1679_s18 + $0x450] sm:$0xff] %v604_v4  ;;  %949 = vst [vmem:[%s1679_s18 + $0x50] sm:$0xff] %v572_v5 }
 0x131   : > { %716 = vxpose.xlu1.b32.cont [2/16] %v302_v6, 128  ;;  %v605_v8 = vpop.trf.xlu1  ;;  %684 = vxpose.xlu0.b32.cont [2/16] %v301_v7, 128  ;;  %v573_v9 = vpop.trf.xlu0  ;;  %v334_v6 = vld [vmem:[%s1607_s23 + $0x518] sm:$0xff]  ;;  %v333_v7 = vld [vmem:[%s1607_s23 + $0x510] sm:$0xff] }
 0x132   : > { %1085 = vst [vmem:[%s1679_s18 + $0x490] sm:$0xff] %v605_v8  ;;  %957 = vst [vmem:[%s1679_s18 + $0x90] sm:$0xff] %v573_v9 }
 0x135   : > { %717 = vxpose.xlu1.b32.cont [3/16] %v304_v10, 128  ;;  %v606_v12 = vpop.trf.xlu1  ;;  %685 = vxpose.xlu0.b32.cont [3/16] %v303_v11, 128  ;;  %v574_v13 = vpop.trf.xlu0  ;;  %v336_v10 = vld [vmem:[%s1607_s23 + $0x528] sm:$0xff]  ;;  %v335_v11 = vld [vmem:[%s1607_s23 + $0x520] sm:$0xff] }
 0x136   : > { %1093 = vst [vmem:[%s1679_s18 + $0x4d0] sm:$0xff] %v606_v12  ;;  %965 = vst [vmem:[%s1679_s18 + $0xd0] sm:$0xff] %v574_v13 }
 0x139   : > { %718 = vxpose.xlu1.b32.cont [4/16] %v306_v14, 128  ;;  %v607_v16 = vpop.trf.xlu1  ;;  %686 = vxpose.xlu0.b32.cont [4/16] %v305_v15, 128  ;;  %v575_v17 = vpop.trf.xlu0  ;;  %v338_v14 = vld [vmem:[%s1607_s23 + $0x538] sm:$0xff]  ;;  %v337_v15 = vld [vmem:[%s1607_s23 + $0x530] sm:$0xff] }
 0x13a   : > { %1101 = vst [vmem:[%s1679_s18 + $0x510] sm:$0xff] %v607_v16  ;;  %973 = vst [vmem:[%s1679_s18 + $0x110] sm:$0xff] %v575_v17 }
 0x13d   : > { %719 = vxpose.xlu1.b32.cont [5/16] %v308_v18, 128  ;;  %v608_v20 = vpop.trf.xlu1  ;;  %687 = vxpose.xlu0.b32.cont [5/16] %v307_v19, 128  ;;  %v576_v21 = vpop.trf.xlu0  ;;  %v340_v18 = vld [vmem:[%s1607_s23 + $0x548] sm:$0xff]  ;;  %v339_v19 = vld [vmem:[%s1607_s23 + $0x540] sm:$0xff] }
 0x13e   : > { %1109 = vst [vmem:[%s1679_s18 + $0x550] sm:$0xff] %v608_v20  ;;  %981 = vst [vmem:[%s1679_s18 + $0x150] sm:$0xff] %v576_v21 }
 0x141   : > { %720 = vxpose.xlu1.b32.cont [6/16] %v310_v22, 128  ;;  %v609_v24 = vpop.trf.xlu1  ;;  %688 = vxpose.xlu0.b32.cont [6/16] %v309_v23, 128  ;;  %v577_v25 = vpop.trf.xlu0  ;;  %v342_v22 = vld [vmem:[%s1607_s23 + $0x558] sm:$0xff]  ;;  %v341_v23 = vld [vmem:[%s1607_s23 + $0x550] sm:$0xff] }
 0x142   : > { %1117 = vst [vmem:[%s1679_s18 + $0x590] sm:$0xff] %v609_v24  ;;  %989 = vst [vmem:[%s1679_s18 + $0x190] sm:$0xff] %v577_v25 }
 0x145   : > { %721 = vxpose.xlu1.b32.cont [7/16] %v312_v26, 128  ;;  %v610_v28 = vpop.trf.xlu1  ;;  %689 = vxpose.xlu0.b32.cont [7/16] %v311_v27, 128  ;;  %v578_v29 = vpop.trf.xlu0  ;;  %v344_v26 = vld [vmem:[%s1607_s23 + $0x568] sm:$0xff]  ;;  %v343_v27 = vld [vmem:[%s1607_s23 + $0x560] sm:$0xff] }
 0x146   : > { %1125 = vst [vmem:[%s1679_s18 + $0x5d0] sm:$0xff] %v610_v28  ;;  %997 = vst [vmem:[%s1679_s18 + $0x1d0] sm:$0xff] %v578_v29 }
 0x149   : > { %722 = vxpose.xlu1.b32.cont [8/16] %v314_v30, 128  ;;  %v611_v32 = vpop.trf.xlu1  ;;  %690 = vxpose.xlu0.b32.cont [8/16] %v313_v31, 128  ;;  %v579_v33 = vpop.trf.xlu0  ;;  %v346_v30 = vld [vmem:[%s1607_s23 + $0x578] sm:$0xff]  ;;  %v345_v31 = vld [vmem:[%s1607_s23 + $0x570] sm:$0xff] }
 0x14a   : > { %1133 = vst [vmem:[%s1679_s18 + $0x610] sm:$0xff] %v611_v32  ;;  %1005 = vst [vmem:[%s1679_s18 + $0x210] sm:$0xff] %v579_v33 }
 0x14d   : > { %723 = vxpose.xlu1.b32.cont [9/16] %v316_v34, 128  ;;  %v612_v36 = vpop.trf.xlu1  ;;  %691 = vxpose.xlu0.b32.cont [9/16] %v315_v35, 128  ;;  %v580_v37 = vpop.trf.xlu0  ;;  %v348_v34 = vld [vmem:[%s1607_s23 + $0x588] sm:$0xff]  ;;  %v347_v35 = vld [vmem:[%s1607_s23 + $0x580] sm:$0xff] }
 0x14e   : > { %1141 = vst [vmem:[%s1679_s18 + $0x650] sm:$0xff] %v612_v36  ;;  %1013 = vst [vmem:[%s1679_s18 + $0x250] sm:$0xff] %v580_v37 }
 0x151   : > { %724 = vxpose.xlu1.b32.cont [10/16] %v318_v38, 128  ;;  %v613_v40 = vpop.trf.xlu1  ;;  %692 = vxpose.xlu0.b32.cont [10/16] %v317_v39, 128  ;;  %v581_v41 = vpop.trf.xlu0  ;;  %v350_v38 = vld [vmem:[%s1607_s23 + $0x598] sm:$0xff]  ;;  %v349_v39 = vld [vmem:[%s1607_s23 + $0x590] sm:$0xff] }
 0x152   : > { %1149 = vst [vmem:[%s1679_s18 + $0x690] sm:$0xff] %v613_v40  ;;  %1021 = vst [vmem:[%s1679_s18 + $0x290] sm:$0xff] %v581_v41 }
 0x155   : > { %725 = vxpose.xlu1.b32.cont [11/16] %v320_v42, 128  ;;  %v614_v44 = vpop.trf.xlu1  ;;  %693 = vxpose.xlu0.b32.cont [11/16] %v319_v43, 128  ;;  %v582_v45 = vpop.trf.xlu0  ;;  %v352_v42 = vld [vmem:[%s1607_s23 + $0x5a8] sm:$0xff]  ;;  %v351_v43 = vld [vmem:[%s1607_s23 + $0x5a0] sm:$0xff] }
 0x156   : > { %1157 = vst [vmem:[%s1679_s18 + $0x6d0] sm:$0xff] %v614_v44  ;;  %1029 = vst [vmem:[%s1679_s18 + $0x2d0] sm:$0xff] %v582_v45 }
 0x159   : > { %726 = vxpose.xlu1.b32.cont [12/16] %v322_v46, 128  ;;  %v615_v48 = vpop.trf.xlu1  ;;  %694 = vxpose.xlu0.b32.cont [12/16] %v321_v47, 128  ;;  %v583_v49 = vpop.trf.xlu0  ;;  %v354_v46 = vld [vmem:[%s1607_s23 + $0x5b8] sm:$0xff]  ;;  %v353_v47 = vld [vmem:[%s1607_s23 + $0x5b0] sm:$0xff] }
 0x15a   : > { %1165 = vst [vmem:[%s1679_s18 + $0x710] sm:$0xff] %v615_v48  ;;  %1037 = vst [vmem:[%s1679_s18 + $0x310] sm:$0xff] %v583_v49 }
 0x15d   : > { %727 = vxpose.xlu1.b32.cont [13/16] %v324_v50, 128  ;;  %v616_v52 = vpop.trf.xlu1  ;;  %695 = vxpose.xlu0.b32.cont [13/16] %v323_v51, 128  ;;  %v584_v53 = vpop.trf.xlu0  ;;  %v356_v50 = vld [vmem:[%s1607_s23 + $0x5c8] sm:$0xff]  ;;  %v355_v51 = vld [vmem:[%s1607_s23 + $0x5c0] sm:$0xff] }
 0x15e   : > { %1173 = vst [vmem:[%s1679_s18 + $0x750] sm:$0xff] %v616_v52  ;;  %1045 = vst [vmem:[%s1679_s18 + $0x350] sm:$0xff] %v584_v53 }
 0x161   : > { %728 = vxpose.xlu1.b32.cont [14/16] %v326_v54, 128  ;;  %v617_v56 = vpop.trf.xlu1  ;;  %696 = vxpose.xlu0.b32.cont [14/16] %v325_v55, 128  ;;  %v585_v57 = vpop.trf.xlu0  ;;  %v358_v54 = vld [vmem:[%s1607_s23 + $0x5d8] sm:$0xff]  ;;  %v357_v55 = vld [vmem:[%s1607_s23 + $0x5d0] sm:$0xff] }
 0x162   : > { %1181 = vst [vmem:[%s1679_s18 + $0x790] sm:$0xff] %v617_v56  ;;  %1053 = vst [vmem:[%s1679_s18 + $0x390] sm:$0xff] %v585_v57 }
 0x165   : > { %729 = vxpose.xlu1.b32.cont [15/16] %v328_v58, 128  ;;  %v618_v60 = vpop.trf.xlu1  ;;  %697 = vxpose.xlu0.b32.cont [15/16] %v327_v59, 128  ;;  %v586_v61 = vpop.trf.xlu0  ;;  %v360_v58 = vld [vmem:[%s1607_s23 + $0x5e8] sm:$0xff]  ;;  %v359_v59 = vld [vmem:[%s1607_s23 + $0x5e0] sm:$0xff] }
 0x166   : > { %1189 = vst [vmem:[%s1679_s18 + $0x7d0] sm:$0xff] %v618_v60  ;;  %1061 = vst [vmem:[%s1679_s18 + $0x3d0] sm:$0xff] %v586_v61 }
 0x169   : > { %730 = vxpose.xlu1.b32.end [16/16] %v330_v62, 128  ;;  %v667_v0 = vpop.trf.xlu1  ;;  %698 = vxpose.xlu0.b32.end [16/16] %v329_v63, 128  ;;  %v635_v1 = vpop.trf.xlu0  ;;  %v362_v62 = vld [vmem:[%s1607_s23 + $0x5f8] sm:$0xff]  ;;  %v361_v63 = vld [vmem:[%s1607_s23 + $0x5f0] sm:$0xff] }
 0x16a   : > { %1070 = vst [vmem:[%s1679_s18 + $0x418] sm:$0xff] %v667_v0  ;;  %942 = vst [vmem:[%s1679_s18 + $0x18] sm:$0xff] %v635_v1 }
 0x16d   : > { %779 = vxpose.xlu1.b32.start [1/16] %v332_v2, 128  ;;  %v668_v4 = vpop.trf.xlu1  ;;  %747 = vxpose.xlu0.b32.start [1/16] %v331_v3, 128  ;;  %v636_v5 = vpop.trf.xlu0  ;;  %v364_v2 = vld [vmem:[%s1607_s23 + $0x608] sm:$0xff]  ;;  %v363_v3 = vld [vmem:[%s1607_s23 + $0x600] sm:$0xff] }
 0x16e   : > { %1078 = vst [vmem:[%s1679_s18 + $0x458] sm:$0xff] %v668_v4  ;;  %950 = vst [vmem:[%s1679_s18 + $0x58] sm:$0xff] %v636_v5 }
 0x171   : > { %780 = vxpose.xlu1.b32.cont [2/16] %v334_v6, 128  ;;  %v669_v8 = vpop.trf.xlu1  ;;  %748 = vxpose.xlu0.b32.cont [2/16] %v333_v7, 128  ;;  %v637_v9 = vpop.trf.xlu0  ;;  %v366_v6 = vld [vmem:[%s1607_s23 + $0x618] sm:$0xff]  ;;  %v365_v7 = vld [vmem:[%s1607_s23 + $0x610] sm:$0xff] }
 0x172   : > { %1086 = vst [vmem:[%s1679_s18 + $0x498] sm:$0xff] %v669_v8  ;;  %958 = vst [vmem:[%s1679_s18 + $0x98] sm:$0xff] %v637_v9 }
 0x175   : > { %781 = vxpose.xlu1.b32.cont [3/16] %v336_v10, 128  ;;  %v670_v12 = vpop.trf.xlu1  ;;  %749 = vxpose.xlu0.b32.cont [3/16] %v335_v11, 128  ;;  %v638_v13 = vpop.trf.xlu0  ;;  %v368_v10 = vld [vmem:[%s1607_s23 + $0x628] sm:$0xff]  ;;  %v367_v11 = vld [vmem:[%s1607_s23 + $0x620] sm:$0xff] }
 0x176   : > { %1094 = vst [vmem:[%s1679_s18 + $0x4d8] sm:$0xff] %v670_v12  ;;  %966 = vst [vmem:[%s1679_s18 + $0xd8] sm:$0xff] %v638_v13 }
 0x179   : > { %782 = vxpose.xlu1.b32.cont [4/16] %v338_v14, 128  ;;  %v671_v16 = vpop.trf.xlu1  ;;  %750 = vxpose.xlu0.b32.cont [4/16] %v337_v15, 128  ;;  %v639_v17 = vpop.trf.xlu0  ;;  %v370_v14 = vld [vmem:[%s1607_s23 + $0x638] sm:$0xff]  ;;  %v369_v15 = vld [vmem:[%s1607_s23 + $0x630] sm:$0xff] }
 0x17a   : > { %1102 = vst [vmem:[%s1679_s18 + $0x518] sm:$0xff] %v671_v16  ;;  %974 = vst [vmem:[%s1679_s18 + $0x118] sm:$0xff] %v639_v17 }
 0x17d   : > { %783 = vxpose.xlu1.b32.cont [5/16] %v340_v18, 128  ;;  %v672_v20 = vpop.trf.xlu1  ;;  %751 = vxpose.xlu0.b32.cont [5/16] %v339_v19, 128  ;;  %v640_v21 = vpop.trf.xlu0  ;;  %v372_v18 = vld [vmem:[%s1607_s23 + $0x648] sm:$0xff]  ;;  %v371_v19 = vld [vmem:[%s1607_s23 + $0x640] sm:$0xff] }
 0x17e   : > { %1110 = vst [vmem:[%s1679_s18 + $0x558] sm:$0xff] %v672_v20  ;;  %982 = vst [vmem:[%s1679_s18 + $0x158] sm:$0xff] %v640_v21 }
 0x181   : > { %784 = vxpose.xlu1.b32.cont [6/16] %v342_v22, 128  ;;  %v673_v24 = vpop.trf.xlu1  ;;  %752 = vxpose.xlu0.b32.cont [6/16] %v341_v23, 128  ;;  %v641_v25 = vpop.trf.xlu0  ;;  %v374_v22 = vld [vmem:[%s1607_s23 + $0x658] sm:$0xff]  ;;  %v373_v23 = vld [vmem:[%s1607_s23 + $0x650] sm:$0xff] }
 0x182   : > { %1118 = vst [vmem:[%s1679_s18 + $0x598] sm:$0xff] %v673_v24  ;;  %990 = vst [vmem:[%s1679_s18 + $0x198] sm:$0xff] %v641_v25 }
 0x185   : > { %785 = vxpose.xlu1.b32.cont [7/16] %v344_v26, 128  ;;  %v674_v28 = vpop.trf.xlu1  ;;  %753 = vxpose.xlu0.b32.cont [7/16] %v343_v27, 128  ;;  %v642_v29 = vpop.trf.xlu0  ;;  %v376_v26 = vld [vmem:[%s1607_s23 + $0x668] sm:$0xff]  ;;  %v375_v27 = vld [vmem:[%s1607_s23 + $0x660] sm:$0xff] }
 0x186   : > { %1126 = vst [vmem:[%s1679_s18 + $0x5d8] sm:$0xff] %v674_v28  ;;  %998 = vst [vmem:[%s1679_s18 + $0x1d8] sm:$0xff] %v642_v29 }
 0x189   : > { %786 = vxpose.xlu1.b32.cont [8/16] %v346_v30, 128  ;;  %v675_v32 = vpop.trf.xlu1  ;;  %754 = vxpose.xlu0.b32.cont [8/16] %v345_v31, 128  ;;  %v643_v33 = vpop.trf.xlu0  ;;  %v378_v30 = vld [vmem:[%s1607_s23 + $0x678] sm:$0xff]  ;;  %v377_v31 = vld [vmem:[%s1607_s23 + $0x670] sm:$0xff] }
 0x18a   : > { %1134 = vst [vmem:[%s1679_s18 + $0x618] sm:$0xff] %v675_v32  ;;  %1006 = vst [vmem:[%s1679_s18 + $0x218] sm:$0xff] %v643_v33 }
 0x18d   : > { %787 = vxpose.xlu1.b32.cont [9/16] %v348_v34, 128  ;;  %v676_v36 = vpop.trf.xlu1  ;;  %755 = vxpose.xlu0.b32.cont [9/16] %v347_v35, 128  ;;  %v644_v37 = vpop.trf.xlu0  ;;  %v380_v34 = vld [vmem:[%s1607_s23 + $0x688] sm:$0xff]  ;;  %v379_v35 = vld [vmem:[%s1607_s23 + $0x680] sm:$0xff] }
 0x18e   : > { %1142 = vst [vmem:[%s1679_s18 + $0x658] sm:$0xff] %v676_v36  ;;  %1014 = vst [vmem:[%s1679_s18 + $0x258] sm:$0xff] %v644_v37 }
 0x191   : > { %788 = vxpose.xlu1.b32.cont [10/16] %v350_v38, 128  ;;  %v677_v40 = vpop.trf.xlu1  ;;  %756 = vxpose.xlu0.b32.cont [10/16] %v349_v39, 128  ;;  %v645_v41 = vpop.trf.xlu0  ;;  %v382_v38 = vld [vmem:[%s1607_s23 + $0x698] sm:$0xff]  ;;  %v381_v39 = vld [vmem:[%s1607_s23 + $0x690] sm:$0xff] }
 0x192   : > { %1150 = vst [vmem:[%s1679_s18 + $0x698] sm:$0xff] %v677_v40  ;;  %1022 = vst [vmem:[%s1679_s18 + $0x298] sm:$0xff] %v645_v41 }
 0x195   : > { %789 = vxpose.xlu1.b32.cont [11/16] %v352_v42, 128  ;;  %v678_v44 = vpop.trf.xlu1  ;;  %757 = vxpose.xlu0.b32.cont [11/16] %v351_v43, 128  ;;  %v646_v45 = vpop.trf.xlu0  ;;  %v384_v42 = vld [vmem:[%s1607_s23 + $0x6a8] sm:$0xff]  ;;  %v383_v43 = vld [vmem:[%s1607_s23 + $0x6a0] sm:$0xff] }
 0x196   : > { %1158 = vst [vmem:[%s1679_s18 + $0x6d8] sm:$0xff] %v678_v44  ;;  %1030 = vst [vmem:[%s1679_s18 + $0x2d8] sm:$0xff] %v646_v45 }
 0x199   : > { %790 = vxpose.xlu1.b32.cont [12/16] %v354_v46, 128  ;;  %v679_v48 = vpop.trf.xlu1  ;;  %758 = vxpose.xlu0.b32.cont [12/16] %v353_v47, 128  ;;  %v647_v49 = vpop.trf.xlu0  ;;  %v386_v46 = vld [vmem:[%s1607_s23 + $0x6b8] sm:$0xff]  ;;  %v385_v47 = vld [vmem:[%s1607_s23 + $0x6b0] sm:$0xff] }
 0x19a   : > { %1166 = vst [vmem:[%s1679_s18 + $0x718] sm:$0xff] %v679_v48  ;;  %1038 = vst [vmem:[%s1679_s18 + $0x318] sm:$0xff] %v647_v49 }
 0x19d   : > { %791 = vxpose.xlu1.b32.cont [13/16] %v356_v50, 128  ;;  %v680_v52 = vpop.trf.xlu1  ;;  %759 = vxpose.xlu0.b32.cont [13/16] %v355_v51, 128  ;;  %v648_v53 = vpop.trf.xlu0  ;;  %v388_v50 = vld [vmem:[%s1607_s23 + $0x6c8] sm:$0xff]  ;;  %v387_v51 = vld [vmem:[%s1607_s23 + $0x6c0] sm:$0xff] }
 0x19e   : > { %1174 = vst [vmem:[%s1679_s18 + $0x758] sm:$0xff] %v680_v52  ;;  %1046 = vst [vmem:[%s1679_s18 + $0x358] sm:$0xff] %v648_v53 }
 0x1a1   : > { %792 = vxpose.xlu1.b32.cont [14/16] %v358_v54, 128  ;;  %v681_v56 = vpop.trf.xlu1  ;;  %760 = vxpose.xlu0.b32.cont [14/16] %v357_v55, 128  ;;  %v649_v57 = vpop.trf.xlu0  ;;  %v390_v54 = vld [vmem:[%s1607_s23 + $0x6d8] sm:$0xff]  ;;  %v389_v55 = vld [vmem:[%s1607_s23 + $0x6d0] sm:$0xff] }
 0x1a2   : > { %1182 = vst [vmem:[%s1679_s18 + $0x798] sm:$0xff] %v681_v56  ;;  %1054 = vst [vmem:[%s1679_s18 + $0x398] sm:$0xff] %v649_v57 }
 0x1a5   : > { %793 = vxpose.xlu1.b32.cont [15/16] %v360_v58, 128  ;;  %v682_v60 = vpop.trf.xlu1  ;;  %761 = vxpose.xlu0.b32.cont [15/16] %v359_v59, 128  ;;  %v650_v61 = vpop.trf.xlu0  ;;  %v392_v58 = vld [vmem:[%s1607_s23 + $0x6e8] sm:$0xff]  ;;  %v391_v59 = vld [vmem:[%s1607_s23 + $0x6e0] sm:$0xff] }
 0x1a6   : > { %1190 = vst [vmem:[%s1679_s18 + $0x7d8] sm:$0xff] %v682_v60  ;;  %1062 = vst [vmem:[%s1679_s18 + $0x3d8] sm:$0xff] %v650_v61 }
 0x1a9   : > { %794 = vxpose.xlu1.b32.end [16/16] %v362_v62, 128  ;;  %v731_v0 = vpop.trf.xlu1  ;;  %762 = vxpose.xlu0.b32.end [16/16] %v361_v63, 128  ;;  %v699_v1 = vpop.trf.xlu0  ;;  %v394_v62 = vld [vmem:[%s1607_s23 + $0x6f8] sm:$0xff]  ;;  %v393_v63 = vld [vmem:[%s1607_s23 + $0x6f0] sm:$0xff] }
 0x1aa   : > { %1071 = vst [vmem:[%s1679_s18 + $0x420] sm:$0xff] %v731_v0  ;;  %943 = vst [vmem:[%s1679_s18 + $0x20] sm:$0xff] %v699_v1 }
 0x1ad   : > { %843 = vxpose.xlu1.b32.start [1/16] %v364_v2, 128  ;;  %v732_v4 = vpop.trf.xlu1  ;;  %811 = vxpose.xlu0.b32.start [1/16] %v363_v3, 128  ;;  %v700_v5 = vpop.trf.xlu0  ;;  %v396_v2 = vld [vmem:[%s1607_s23 + $0x708] sm:$0xff]  ;;  %v395_v3 = vld [vmem:[%s1607_s23 + $0x700] sm:$0xff] }
 0x1ae   : > { %1079 = vst [vmem:[%s1679_s18 + $0x460] sm:$0xff] %v732_v4  ;;  %951 = vst [vmem:[%s1679_s18 + $0x60] sm:$0xff] %v700_v5 }
 0x1b1   : > { %844 = vxpose.xlu1.b32.cont [2/16] %v366_v6, 128  ;;  %v733_v8 = vpop.trf.xlu1  ;;  %812 = vxpose.xlu0.b32.cont [2/16] %v365_v7, 128  ;;  %v701_v9 = vpop.trf.xlu0  ;;  %v398_v6 = vld [vmem:[%s1607_s23 + $0x718] sm:$0xff]  ;;  %v397_v7 = vld [vmem:[%s1607_s23 + $0x710] sm:$0xff] }
 0x1b2   : > { %1087 = vst [vmem:[%s1679_s18 + $0x4a0] sm:$0xff] %v733_v8  ;;  %959 = vst [vmem:[%s1679_s18 + $0xa0] sm:$0xff] %v701_v9 }
 0x1b5   : > { %845 = vxpose.xlu1.b32.cont [3/16] %v368_v10, 128  ;;  %v734_v12 = vpop.trf.xlu1  ;;  %813 = vxpose.xlu0.b32.cont [3/16] %v367_v11, 128  ;;  %v702_v13 = vpop.trf.xlu0  ;;  %v400_v10 = vld [vmem:[%s1607_s23 + $0x728] sm:$0xff]  ;;  %v399_v11 = vld [vmem:[%s1607_s23 + $0x720] sm:$0xff] }
 0x1b6   : > { %1095 = vst [vmem:[%s1679_s18 + $0x4e0] sm:$0xff] %v734_v12  ;;  %967 = vst [vmem:[%s1679_s18 + $0xe0] sm:$0xff] %v702_v13 }
 0x1b9   : > { %846 = vxpose.xlu1.b32.cont [4/16] %v370_v14, 128  ;;  %v735_v16 = vpop.trf.xlu1  ;;  %814 = vxpose.xlu0.b32.cont [4/16] %v369_v15, 128  ;;  %v703_v17 = vpop.trf.xlu0  ;;  %v402_v14 = vld [vmem:[%s1607_s23 + $0x738] sm:$0xff]  ;;  %v401_v15 = vld [vmem:[%s1607_s23 + $0x730] sm:$0xff] }
 0x1ba   : > { %1103 = vst [vmem:[%s1679_s18 + $0x520] sm:$0xff] %v735_v16  ;;  %975 = vst [vmem:[%s1679_s18 + $0x120] sm:$0xff] %v703_v17 }
 0x1bd   : > { %847 = vxpose.xlu1.b32.cont [5/16] %v372_v18, 128  ;;  %v736_v20 = vpop.trf.xlu1  ;;  %815 = vxpose.xlu0.b32.cont [5/16] %v371_v19, 128  ;;  %v704_v21 = vpop.trf.xlu0  ;;  %v404_v18 = vld [vmem:[%s1607_s23 + $0x748] sm:$0xff]  ;;  %v403_v19 = vld [vmem:[%s1607_s23 + $0x740] sm:$0xff] }
 0x1be   : > { %1111 = vst [vmem:[%s1679_s18 + $0x560] sm:$0xff] %v736_v20  ;;  %983 = vst [vmem:[%s1679_s18 + $0x160] sm:$0xff] %v704_v21 }
 0x1c1   : > { %848 = vxpose.xlu1.b32.cont [6/16] %v374_v22, 128  ;;  %v737_v24 = vpop.trf.xlu1  ;;  %816 = vxpose.xlu0.b32.cont [6/16] %v373_v23, 128  ;;  %v705_v25 = vpop.trf.xlu0  ;;  %v406_v22 = vld [vmem:[%s1607_s23 + $0x758] sm:$0xff]  ;;  %v405_v23 = vld [vmem:[%s1607_s23 + $0x750] sm:$0xff] }
 0x1c2   : > { %1119 = vst [vmem:[%s1679_s18 + $0x5a0] sm:$0xff] %v737_v24  ;;  %991 = vst [vmem:[%s1679_s18 + $0x1a0] sm:$0xff] %v705_v25 }
 0x1c5   : > { %849 = vxpose.xlu1.b32.cont [7/16] %v376_v26, 128  ;;  %v738_v28 = vpop.trf.xlu1  ;;  %817 = vxpose.xlu0.b32.cont [7/16] %v375_v27, 128  ;;  %v706_v29 = vpop.trf.xlu0  ;;  %v408_v26 = vld [vmem:[%s1607_s23 + $0x768] sm:$0xff]  ;;  %v407_v27 = vld [vmem:[%s1607_s23 + $0x760] sm:$0xff] }
 0x1c6   : > { %1127 = vst [vmem:[%s1679_s18 + $0x5e0] sm:$0xff] %v738_v28  ;;  %999 = vst [vmem:[%s1679_s18 + $0x1e0] sm:$0xff] %v706_v29 }
 0x1c9   : > { %850 = vxpose.xlu1.b32.cont [8/16] %v378_v30, 128  ;;  %v739_v32 = vpop.trf.xlu1  ;;  %818 = vxpose.xlu0.b32.cont [8/16] %v377_v31, 128  ;;  %v707_v33 = vpop.trf.xlu0  ;;  %v410_v30 = vld [vmem:[%s1607_s23 + $0x778] sm:$0xff]  ;;  %v409_v31 = vld [vmem:[%s1607_s23 + $0x770] sm:$0xff] }
 0x1ca   : > { %1135 = vst [vmem:[%s1679_s18 + $0x620] sm:$0xff] %v739_v32  ;;  %1007 = vst [vmem:[%s1679_s18 + $0x220] sm:$0xff] %v707_v33 }
 0x1cd   : > { %851 = vxpose.xlu1.b32.cont [9/16] %v380_v34, 128  ;;  %v740_v36 = vpop.trf.xlu1  ;;  %819 = vxpose.xlu0.b32.cont [9/16] %v379_v35, 128  ;;  %v708_v37 = vpop.trf.xlu0  ;;  %v412_v34 = vld [vmem:[%s1607_s23 + $0x788] sm:$0xff]  ;;  %v411_v35 = vld [vmem:[%s1607_s23 + $0x780] sm:$0xff] }
 0x1ce   : > { %1143 = vst [vmem:[%s1679_s18 + $0x660] sm:$0xff] %v740_v36  ;;  %1015 = vst [vmem:[%s1679_s18 + $0x260] sm:$0xff] %v708_v37 }
 0x1d1   : > { %852 = vxpose.xlu1.b32.cont [10/16] %v382_v38, 128  ;;  %v741_v40 = vpop.trf.xlu1  ;;  %820 = vxpose.xlu0.b32.cont [10/16] %v381_v39, 128  ;;  %v709_v41 = vpop.trf.xlu0  ;;  %v414_v38 = vld [vmem:[%s1607_s23 + $0x798] sm:$0xff]  ;;  %v413_v39 = vld [vmem:[%s1607_s23 + $0x790] sm:$0xff] }
 0x1d2   : > { %1151 = vst [vmem:[%s1679_s18 + $0x6a0] sm:$0xff] %v741_v40  ;;  %1023 = vst [vmem:[%s1679_s18 + $0x2a0] sm:$0xff] %v709_v41 }
 0x1d5   : > { %853 = vxpose.xlu1.b32.cont [11/16] %v384_v42, 128  ;;  %v742_v44 = vpop.trf.xlu1  ;;  %821 = vxpose.xlu0.b32.cont [11/16] %v383_v43, 128  ;;  %v710_v45 = vpop.trf.xlu0  ;;  %v416_v42 = vld [vmem:[%s1607_s23 + $0x7a8] sm:$0xff]  ;;  %v415_v43 = vld [vmem:[%s1607_s23 + $0x7a0] sm:$0xff] }
 0x1d6   : > { %1159 = vst [vmem:[%s1679_s18 + $0x6e0] sm:$0xff] %v742_v44  ;;  %1031 = vst [vmem:[%s1679_s18 + $0x2e0] sm:$0xff] %v710_v45 }
 0x1d9   : > { %854 = vxpose.xlu1.b32.cont [12/16] %v386_v46, 128  ;;  %v743_v48 = vpop.trf.xlu1  ;;  %822 = vxpose.xlu0.b32.cont [12/16] %v385_v47, 128  ;;  %v711_v49 = vpop.trf.xlu0  ;;  %v418_v46 = vld [vmem:[%s1607_s23 + $0x7b8] sm:$0xff]  ;;  %v417_v47 = vld [vmem:[%s1607_s23 + $0x7b0] sm:$0xff] }
 0x1da   : > { %1167 = vst [vmem:[%s1679_s18 + $0x720] sm:$0xff] %v743_v48  ;;  %1039 = vst [vmem:[%s1679_s18 + $0x320] sm:$0xff] %v711_v49 }
 0x1dd   : > { %855 = vxpose.xlu1.b32.cont [13/16] %v388_v50, 128  ;;  %v744_v52 = vpop.trf.xlu1  ;;  %823 = vxpose.xlu0.b32.cont [13/16] %v387_v51, 128  ;;  %v712_v53 = vpop.trf.xlu0  ;;  %v420_v50 = vld [vmem:[%s1607_s23 + $0x7c8] sm:$0xff]  ;;  %v419_v51 = vld [vmem:[%s1607_s23 + $0x7c0] sm:$0xff] }
 0x1de   : > { %1175 = vst [vmem:[%s1679_s18 + $0x760] sm:$0xff] %v744_v52  ;;  %1047 = vst [vmem:[%s1679_s18 + $0x360] sm:$0xff] %v712_v53 }
 0x1e1   : > { %856 = vxpose.xlu1.b32.cont [14/16] %v390_v54, 128  ;;  %v745_v56 = vpop.trf.xlu1  ;;  %824 = vxpose.xlu0.b32.cont [14/16] %v389_v55, 128  ;;  %v713_v57 = vpop.trf.xlu0  ;;  %v422_v54 = vld [vmem:[%s1607_s23 + $0x7d8] sm:$0xff]  ;;  %v421_v55 = vld [vmem:[%s1607_s23 + $0x7d0] sm:$0xff] }
 0x1e2   : > { %1183 = vst [vmem:[%s1679_s18 + $0x7a0] sm:$0xff] %v745_v56  ;;  %1055 = vst [vmem:[%s1679_s18 + $0x3a0] sm:$0xff] %v713_v57 }
 0x1e5   : > { %857 = vxpose.xlu1.b32.cont [15/16] %v392_v58, 128  ;;  %v746_v60 = vpop.trf.xlu1  ;;  %825 = vxpose.xlu0.b32.cont [15/16] %v391_v59, 128  ;;  %v714_v61 = vpop.trf.xlu0  ;;  %v424_v58 = vld [vmem:[%s1607_s23 + $0x7e8] sm:$0xff]  ;;  %v423_v59 = vld [vmem:[%s1607_s23 + $0x7e0] sm:$0xff] }
 0x1e6   : > { %1191 = vst [vmem:[%s1679_s18 + $0x7e0] sm:$0xff] %v746_v60  ;;  %1063 = vst [vmem:[%s1679_s18 + $0x3e0] sm:$0xff] %v714_v61 }
 0x1e9   : > { %858 = vxpose.xlu1.b32.end [16/16] %v394_v62, 128  ;;  %v795_v0 = vpop.trf.xlu1  ;;  %826 = vxpose.xlu0.b32.end [16/16] %v393_v63, 128  ;;  %v763_v1 = vpop.trf.xlu0  ;;  %v426_v62 = vld [vmem:[%s1607_s23 + $0x7f8] sm:$0xff]  ;;  %v425_v63 = vld [vmem:[%s1607_s23 + $0x7f0] sm:$0xff] }
 0x1ea   : > { %1072 = vst [vmem:[%s1679_s18 + $0x428] sm:$0xff] %v795_v0  ;;  %944 = vst [vmem:[%s1679_s18 + $0x28] sm:$0xff] %v763_v1 }
 0x1ed   : > { %907 = vxpose.xlu1.b32.start [1/16] %v396_v2, 128  ;;  %v796_v4 = vpop.trf.xlu1  ;;  %875 = vxpose.xlu0.b32.start [1/16] %v395_v3, 128  ;;  %v764_v5 = vpop.trf.xlu0 }
 0x1ee   : > { %1080 = vst [vmem:[%s1679_s18 + $0x468] sm:$0xff] %v796_v4  ;;  %952 = vst [vmem:[%s1679_s18 + $0x68] sm:$0xff] %v764_v5 }
 0x1f1   : > { %908 = vxpose.xlu1.b32.cont [2/16] %v398_v6, 128  ;;  %v797_v8 = vpop.trf.xlu1  ;;  %876 = vxpose.xlu0.b32.cont [2/16] %v397_v7, 128  ;;  %v765_v9 = vpop.trf.xlu0 }
 0x1f2   : > { %1088 = vst [vmem:[%s1679_s18 + $0x4a8] sm:$0xff] %v797_v8  ;;  %960 = vst [vmem:[%s1679_s18 + $0xa8] sm:$0xff] %v765_v9 }
 0x1f5   : > { %909 = vxpose.xlu1.b32.cont [3/16] %v400_v10, 128  ;;  %v798_v12 = vpop.trf.xlu1  ;;  %877 = vxpose.xlu0.b32.cont [3/16] %v399_v11, 128  ;;  %v766_v13 = vpop.trf.xlu0 }
 0x1f6   : > { %1096 = vst [vmem:[%s1679_s18 + $0x4e8] sm:$0xff] %v798_v12  ;;  %968 = vst [vmem:[%s1679_s18 + $0xe8] sm:$0xff] %v766_v13 }
 0x1f9   : > { %910 = vxpose.xlu1.b32.cont [4/16] %v402_v14, 128  ;;  %v799_v16 = vpop.trf.xlu1  ;;  %878 = vxpose.xlu0.b32.cont [4/16] %v401_v15, 128  ;;  %v767_v17 = vpop.trf.xlu0 }
 0x1fa   : > { %1104 = vst [vmem:[%s1679_s18 + $0x528] sm:$0xff] %v799_v16  ;;  %976 = vst [vmem:[%s1679_s18 + $0x128] sm:$0xff] %v767_v17 }
 0x1fd   : > { %911 = vxpose.xlu1.b32.cont [5/16] %v404_v18, 128  ;;  %v800_v20 = vpop.trf.xlu1  ;;  %879 = vxpose.xlu0.b32.cont [5/16] %v403_v19, 128  ;;  %v768_v21 = vpop.trf.xlu0 }
 0x1fe   : > { %1112 = vst [vmem:[%s1679_s18 + $0x568] sm:$0xff] %v800_v20  ;;  %984 = vst [vmem:[%s1679_s18 + $0x168] sm:$0xff] %v768_v21 }
 0x201   : > { %912 = vxpose.xlu1.b32.cont [6/16] %v406_v22, 128  ;;  %v801_v24 = vpop.trf.xlu1  ;;  %880 = vxpose.xlu0.b32.cont [6/16] %v405_v23, 128  ;;  %v769_v25 = vpop.trf.xlu0 }
 0x202   : > { %1120 = vst [vmem:[%s1679_s18 + $0x5a8] sm:$0xff] %v801_v24  ;;  %992 = vst [vmem:[%s1679_s18 + $0x1a8] sm:$0xff] %v769_v25 }
 0x205   : > { %913 = vxpose.xlu1.b32.cont [7/16] %v408_v26, 128  ;;  %v802_v28 = vpop.trf.xlu1  ;;  %881 = vxpose.xlu0.b32.cont [7/16] %v407_v27, 128  ;;  %v770_v29 = vpop.trf.xlu0 }
 0x206   : > { %1128 = vst [vmem:[%s1679_s18 + $0x5e8] sm:$0xff] %v802_v28  ;;  %1000 = vst [vmem:[%s1679_s18 + $0x1e8] sm:$0xff] %v770_v29 }
 0x209   : > { %914 = vxpose.xlu1.b32.cont [8/16] %v410_v30, 128  ;;  %v803_v32 = vpop.trf.xlu1  ;;  %882 = vxpose.xlu0.b32.cont [8/16] %v409_v31, 128  ;;  %v771_v33 = vpop.trf.xlu0 }
 0x20a   : > { %1136 = vst [vmem:[%s1679_s18 + $0x628] sm:$0xff] %v803_v32  ;;  %1008 = vst [vmem:[%s1679_s18 + $0x228] sm:$0xff] %v771_v33 }
 0x20d   : > { %915 = vxpose.xlu1.b32.cont [9/16] %v412_v34, 128  ;;  %v804_v36 = vpop.trf.xlu1  ;;  %883 = vxpose.xlu0.b32.cont [9/16] %v411_v35, 128  ;;  %v772_v37 = vpop.trf.xlu0 }
 0x20e   : > { %1144 = vst [vmem:[%s1679_s18 + $0x668] sm:$0xff] %v804_v36  ;;  %1016 = vst [vmem:[%s1679_s18 + $0x268] sm:$0xff] %v772_v37 }
 0x211   : > { %916 = vxpose.xlu1.b32.cont [10/16] %v414_v38, 128  ;;  %v805_v40 = vpop.trf.xlu1  ;;  %884 = vxpose.xlu0.b32.cont [10/16] %v413_v39, 128  ;;  %v773_v41 = vpop.trf.xlu0 }
 0x212   : > { %1152 = vst [vmem:[%s1679_s18 + $0x6a8] sm:$0xff] %v805_v40  ;;  %1024 = vst [vmem:[%s1679_s18 + $0x2a8] sm:$0xff] %v773_v41 }
 0x215   : > { %917 = vxpose.xlu1.b32.cont [11/16] %v416_v42, 128  ;;  %v806_v44 = vpop.trf.xlu1  ;;  %885 = vxpose.xlu0.b32.cont [11/16] %v415_v43, 128  ;;  %v774_v45 = vpop.trf.xlu0 }
 0x216   : > { %1160 = vst [vmem:[%s1679_s18 + $0x6e8] sm:$0xff] %v806_v44  ;;  %1032 = vst [vmem:[%s1679_s18 + $0x2e8] sm:$0xff] %v774_v45 }
 0x219   : > { %918 = vxpose.xlu1.b32.cont [12/16] %v418_v46, 128  ;;  %v807_v48 = vpop.trf.xlu1  ;;  %886 = vxpose.xlu0.b32.cont [12/16] %v417_v47, 128  ;;  %v775_v49 = vpop.trf.xlu0 }
 0x21a   : > { %1168 = vst [vmem:[%s1679_s18 + $0x728] sm:$0xff] %v807_v48  ;;  %1040 = vst [vmem:[%s1679_s18 + $0x328] sm:$0xff] %v775_v49 }
 0x21d   : > { %919 = vxpose.xlu1.b32.cont [13/16] %v420_v50, 128  ;;  %v808_v52 = vpop.trf.xlu1  ;;  %887 = vxpose.xlu0.b32.cont [13/16] %v419_v51, 128  ;;  %v776_v53 = vpop.trf.xlu0 }
 0x21e   : > { %1176 = vst [vmem:[%s1679_s18 + $0x768] sm:$0xff] %v808_v52  ;;  %1048 = vst [vmem:[%s1679_s18 + $0x368] sm:$0xff] %v776_v53 }
 0x221   : > { %920 = vxpose.xlu1.b32.cont [14/16] %v422_v54, 128  ;;  %v809_v56 = vpop.trf.xlu1  ;;  %888 = vxpose.xlu0.b32.cont [14/16] %v421_v55, 128  ;;  %v777_v57 = vpop.trf.xlu0 }
 0x222   : > { %1184 = vst [vmem:[%s1679_s18 + $0x7a8] sm:$0xff] %v809_v56  ;;  %1056 = vst [vmem:[%s1679_s18 + $0x3a8] sm:$0xff] %v777_v57 }
 0x225   : > { %921 = vxpose.xlu1.b32.cont [15/16] %v424_v58, 128  ;;  %v810_v60 = vpop.trf.xlu1  ;;  %889 = vxpose.xlu0.b32.cont [15/16] %v423_v59, 128  ;;  %v778_v61 = vpop.trf.xlu0 }
 0x226   : > { %1192 = vst [vmem:[%s1679_s18 + $0x7e8] sm:$0xff] %v810_v60  ;;  %1064 = vst [vmem:[%s1679_s18 + $0x3e8] sm:$0xff] %v778_v61 }
 0x229   : > { %922 = vxpose.xlu1.b32.end [16/16] %v426_v62, 128  ;;  %v859_v0 = vpop.trf.xlu1  ;;  %890 = vxpose.xlu0.b32.end [16/16] %v425_v63, 128  ;;  %v827_v1 = vpop.trf.xlu0 }
 0x22a   : > { %1073 = vst [vmem:[%s1679_s18 + $0x430] sm:$0xff] %v859_v0  ;;  %945 = vst [vmem:[%s1679_s18 + $0x30] sm:$0xff] %v827_v1 }
 0x22d   : > { %v860_v2 = vpop.trf.xlu1  ;;  %v828_v3 = vpop.trf.xlu0 }
 0x22e   : > { %1081 = vst [vmem:[%s1679_s18 + $0x470] sm:$0xff] %v860_v2  ;;  %953 = vst [vmem:[%s1679_s18 + $0x70] sm:$0xff] %v828_v3 }
 0x231   : > { %v861_v4 = vpop.trf.xlu1  ;;  %v829_v5 = vpop.trf.xlu0 }
 0x232   : > { %1089 = vst [vmem:[%s1679_s18 + $0x4b0] sm:$0xff] %v861_v4  ;;  %961 = vst [vmem:[%s1679_s18 + $0xb0] sm:$0xff] %v829_v5 }
 0x235   : > { %v862_v6 = vpop.trf.xlu1  ;;  %v830_v7 = vpop.trf.xlu0 }
 0x236   : > { %1097 = vst [vmem:[%s1679_s18 + $0x4f0] sm:$0xff] %v862_v6  ;;  %969 = vst [vmem:[%s1679_s18 + $0xf0] sm:$0xff] %v830_v7 }
 0x239   : > { %v863_v8 = vpop.trf.xlu1  ;;  %v831_v9 = vpop.trf.xlu0 }
 0x23a   : > { %1105 = vst [vmem:[%s1679_s18 + $0x530] sm:$0xff] %v863_v8  ;;  %977 = vst [vmem:[%s1679_s18 + $0x130] sm:$0xff] %v831_v9 }
 0x23d   : > { %v864_v10 = vpop.trf.xlu1  ;;  %v832_v11 = vpop.trf.xlu0 }
 0x23e   : > { %1113 = vst [vmem:[%s1679_s18 + $0x570] sm:$0xff] %v864_v10  ;;  %985 = vst [vmem:[%s1679_s18 + $0x170] sm:$0xff] %v832_v11 }
 0x241   : > { %v865_v12 = vpop.trf.xlu1  ;;  %v833_v13 = vpop.trf.xlu0 }
 0x242   : > { %1121 = vst [vmem:[%s1679_s18 + $0x5b0] sm:$0xff] %v865_v12  ;;  %993 = vst [vmem:[%s1679_s18 + $0x1b0] sm:$0xff] %v833_v13 }
 0x245   : > { %v866_v14 = vpop.trf.xlu1  ;;  %v834_v15 = vpop.trf.xlu0 }
 0x246   : > { %1129 = vst [vmem:[%s1679_s18 + $0x5f0] sm:$0xff] %v866_v14  ;;  %1001 = vst [vmem:[%s1679_s18 + $0x1f0] sm:$0xff] %v834_v15 }
 0x249   : > { %v867_v16 = vpop.trf.xlu1  ;;  %v835_v17 = vpop.trf.xlu0 }
 0x24a   : > { %1137 = vst [vmem:[%s1679_s18 + $0x630] sm:$0xff] %v867_v16  ;;  %1009 = vst [vmem:[%s1679_s18 + $0x230] sm:$0xff] %v835_v17 }
 0x24d   : > { %v868_v18 = vpop.trf.xlu1  ;;  %v836_v19 = vpop.trf.xlu0 }
 0x24e   : > { %1145 = vst [vmem:[%s1679_s18 + $0x670] sm:$0xff] %v868_v18  ;;  %1017 = vst [vmem:[%s1679_s18 + $0x270] sm:$0xff] %v836_v19 }
 0x251   : > { %v869_v20 = vpop.trf.xlu1  ;;  %v837_v21 = vpop.trf.xlu0 }
 0x252   : > { %1153 = vst [vmem:[%s1679_s18 + $0x6b0] sm:$0xff] %v869_v20  ;;  %1025 = vst [vmem:[%s1679_s18 + $0x2b0] sm:$0xff] %v837_v21 }
 0x255   : > { %v870_v22 = vpop.trf.xlu1  ;;  %v838_v23 = vpop.trf.xlu0 }
 0x256   : > { %1161 = vst [vmem:[%s1679_s18 + $0x6f0] sm:$0xff] %v870_v22  ;;  %1033 = vst [vmem:[%s1679_s18 + $0x2f0] sm:$0xff] %v838_v23 }
 0x259   : > { %v871_v24 = vpop.trf.xlu1  ;;  %v839_v25 = vpop.trf.xlu0 }
 0x25a   : > { %1169 = vst [vmem:[%s1679_s18 + $0x730] sm:$0xff] %v871_v24  ;;  %1041 = vst [vmem:[%s1679_s18 + $0x330] sm:$0xff] %v839_v25 }
 0x25d   : > { %v872_v26 = vpop.trf.xlu1  ;;  %v840_v27 = vpop.trf.xlu0 }
 0x25e   : > { %1177 = vst [vmem:[%s1679_s18 + $0x770] sm:$0xff] %v872_v26  ;;  %1049 = vst [vmem:[%s1679_s18 + $0x370] sm:$0xff] %v840_v27 }
 0x261   : > { %v873_v28 = vpop.trf.xlu1  ;;  %v841_v29 = vpop.trf.xlu0 }
 0x262   : > { %1185 = vst [vmem:[%s1679_s18 + $0x7b0] sm:$0xff] %v873_v28  ;;  %1057 = vst [vmem:[%s1679_s18 + $0x3b0] sm:$0xff] %v841_v29 }
 0x265   : > { %v874_v30 = vpop.trf.xlu1  ;;  %v842_v31 = vpop.trf.xlu0 }
 0x266   : > { %1193 = vst [vmem:[%s1679_s18 + $0x7f0] sm:$0xff] %v874_v30  ;;  %1065 = vst [vmem:[%s1679_s18 + $0x3f0] sm:$0xff] %v842_v31 }
 0x269   : > { %v923_v32 = vpop.trf.xlu1  ;;  %v891_v33 = vpop.trf.xlu0 }
 0x26a   : > { %1074 = vst [vmem:[%s1679_s18 + $0x438] sm:$0xff] %v923_v32  ;;  %946 = vst [vmem:[%s1679_s18 + $0x38] sm:$0xff] %v891_v33 }
 0x26d   : > { %v924_v34 = vpop.trf.xlu1  ;;  %v892_v35 = vpop.trf.xlu0 }
 0x26e   : > { %1082 = vst [vmem:[%s1679_s18 + $0x478] sm:$0xff] %v924_v34  ;;  %954 = vst [vmem:[%s1679_s18 + $0x78] sm:$0xff] %v892_v35 }
 0x271   : > { %v925_v36 = vpop.trf.xlu1  ;;  %v893_v37 = vpop.trf.xlu0 }
 0x272   : > { %1090 = vst [vmem:[%s1679_s18 + $0x4b8] sm:$0xff] %v925_v36  ;;  %962 = vst [vmem:[%s1679_s18 + $0xb8] sm:$0xff] %v893_v37 }
 0x275   : > { %v926_v38 = vpop.trf.xlu1  ;;  %v894_v39 = vpop.trf.xlu0 }
 0x276   : > { %1098 = vst [vmem:[%s1679_s18 + $0x4f8] sm:$0xff] %v926_v38  ;;  %970 = vst [vmem:[%s1679_s18 + $0xf8] sm:$0xff] %v894_v39 }
 0x279   : > { %v927_v40 = vpop.trf.xlu1  ;;  %v895_v41 = vpop.trf.xlu0 }
 0x27a   : > { %1106 = vst [vmem:[%s1679_s18 + $0x538] sm:$0xff] %v927_v40  ;;  %978 = vst [vmem:[%s1679_s18 + $0x138] sm:$0xff] %v895_v41 }
 0x27d   : > { %v928_v42 = vpop.trf.xlu1  ;;  %v896_v43 = vpop.trf.xlu0 }
 0x27e   : > { %1114 = vst [vmem:[%s1679_s18 + $0x578] sm:$0xff] %v928_v42  ;;  %986 = vst [vmem:[%s1679_s18 + $0x178] sm:$0xff] %v896_v43 }
 0x281   : > { %v929_v44 = vpop.trf.xlu1  ;;  %v897_v45 = vpop.trf.xlu0 }
 0x282   : > { %1122 = vst [vmem:[%s1679_s18 + $0x5b8] sm:$0xff] %v929_v44  ;;  %994 = vst [vmem:[%s1679_s18 + $0x1b8] sm:$0xff] %v897_v45 }
 0x285   : > { %v930_v46 = vpop.trf.xlu1  ;;  %v898_v47 = vpop.trf.xlu0 }
 0x286   : > { %1130 = vst [vmem:[%s1679_s18 + $0x5f8] sm:$0xff] %v930_v46  ;;  %1002 = vst [vmem:[%s1679_s18 + $0x1f8] sm:$0xff] %v898_v47 }
 0x289   : > { %v931_v48 = vpop.trf.xlu1  ;;  %v899_v49 = vpop.trf.xlu0 }
 0x28a   : > { %1138 = vst [vmem:[%s1679_s18 + $0x638] sm:$0xff] %v931_v48  ;;  %1010 = vst [vmem:[%s1679_s18 + $0x238] sm:$0xff] %v899_v49 }
 0x28d   : > { %v932_v50 = vpop.trf.xlu1  ;;  %v900_v51 = vpop.trf.xlu0 }
 0x28e   : > { %1146 = vst [vmem:[%s1679_s18 + $0x678] sm:$0xff] %v932_v50  ;;  %1018 = vst [vmem:[%s1679_s18 + $0x278] sm:$0xff] %v900_v51 }
 0x291   : > { %v933_v52 = vpop.trf.xlu1  ;;  %v901_v53 = vpop.trf.xlu0 }
 0x292   : > { %1154 = vst [vmem:[%s1679_s18 + $0x6b8] sm:$0xff] %v933_v52  ;;  %1026 = vst [vmem:[%s1679_s18 + $0x2b8] sm:$0xff] %v901_v53 }
 0x295   : > { %v934_v54 = vpop.trf.xlu1  ;;  %v902_v55 = vpop.trf.xlu0 }
 0x296   : > { %1162 = vst [vmem:[%s1679_s18 + $0x6f8] sm:$0xff] %v934_v54  ;;  %1034 = vst [vmem:[%s1679_s18 + $0x2f8] sm:$0xff] %v902_v55 }
 0x299   : > { %v935_v56 = vpop.trf.xlu1  ;;  %v903_v57 = vpop.trf.xlu0 }
 0x29a   : > { %1170 = vst [vmem:[%s1679_s18 + $0x738] sm:$0xff] %v935_v56  ;;  %1042 = vst [vmem:[%s1679_s18 + $0x338] sm:$0xff] %v903_v57 }
 0x29d   : > { %v936_v58 = vpop.trf.xlu1  ;;  %v904_v59 = vpop.trf.xlu0 }
 0x29e   : > { %1178 = vst [vmem:[%s1679_s18 + $0x778] sm:$0xff] %v936_v58  ;;  %1050 = vst [vmem:[%s1679_s18 + $0x378] sm:$0xff] %v904_v59 }
 0x2a1   : > { %v937_v60 = vpop.trf.xlu1  ;;  %v905_v61 = vpop.trf.xlu0 }
 0x2a2   : > { %1186 = vst [vmem:[%s1679_s18 + $0x7b8] sm:$0xff] %v937_v60  ;;  %1058 = vst [vmem:[%s1679_s18 + $0x3b8] sm:$0xff] %v905_v61 }
 0x2a5   : > { %v938_v62 = vpop.trf.xlu1  ;;  %v906_v63 = vpop.trf.xlu0 }
 0x2a6   : > { %1194 = vst [vmem:[%s1679_s18 + $0x7f8] sm:$0xff] %v938_v62  ;;  %1066 = vst [vmem:[%s1679_s18 + $0x3f8] sm:$0xff] %v906_v63 }
 0x2a7   : > { %1432 = shalt.err (!%p1429_p6)
}
 0x2a8   : > { %s1433_s4 = scalar_lea.hbm %s2132_s28, 32768  ;;  %s1437_s13 = scalar_lea.hbm %s2185_s1, 65536 }
 0x2a9   : > { %p1434_p7 = scmp.ne.s32.totalorder %s2132_s28, %s1433_s4  ;;  %p1438_p13 = scmp.lt.s32.totalorder %s2132_s28, %s2185_s1 }
 0x2aa   : > { %p1439_p2 = scmp.lt.s32.totalorder %s1437_s13, %s1433_s4 }
 0x2ab   : > { %p1435_p10 = pnand %p1434_p7, %p1568_p9 }
 0x2ac   : > { %p1440_p8 = por %p1439_p2, %p1438_p13 }
 0x2ad   : > { %p1436_p4 = pneg %p1435_p10 }
 0x2af   : > { %p1441_p12 = pnand %p1440_p8, %p1436_p4 }
 0x2b1   : > { %1444 = shalt.err (!%p1441_p12)
}
 0x2b2   : > { %s1505_s22 = smov 1024   ;;  %s1506_s23 = smov 64  }
 0x2b3   : > { %1327 = dma.vmem_to_hbm [thread:$0]  (%p1568_p9), %s2134_s25, 32768, %s2132_s28, %s1196_s9, %s1505_s22, %s1505_s22, %s1506_s23  }
 0x2b4 PF: > { %s1229_s18 = sand.u32 1, %s1479_s6   ;;  %p2191_p0 = scmp.ge.s32.totalorder %s1499_s11, 2 }
 0x2b5   : > { %s1230_s24 = scalar_lea.sflag [#allocation4], %s1229_s18 }
 0x2b6   : > { %p1334_p1 = pnand %p2191_p0, %p1575_p11 }
 0x2b8   : > { %p1335_p3 = pneg %p1334_p1 }
 0x2ba   : > { %1474 = dma.done.wait (%p1335_p3), %s1230_s24, 32768  }
 0x2bb   : > { %1476 = vsyncadd (%p1335_p3), %s1230_s24, 4294934528  ;;  %s17_s11 = sadd.s32 1, %s1499_s11   ;;  %s2192_s6 = smov %s1483_s7 }
 0x2bc   : > { %p14_p5 = scmp.ge.s32.totalorder %s17_s11, 4   ;;  %s2193_s7 = smov %s1487_s8 }
 0x2bd   : > { %s2194_s8 = smov %s1573_s20  ;;  %s2195_s9 = smov %s1495_s10 }
 0x2be   : > { %s2196_s10 = smov %s2198_s14  ;;  %16 = sbr.rel (!%p14_p5) target bundleno = 6 (0x6), region = 69 }
 0x2c3   :  { %1235 = vsyncpa [#allocation3], 1 }
 0x2c4   :  { %1237 = vsyncpa [#allocation3 + $0x1], 1 }
 0x2c5   :  { %1238 = vsyncpa [#allocation4], 1 }
 0x2c6   :  { %1240 = vsyncpa [#allocation4 + $0x1], 1 }

</bundles_post_ra>
